<compile_context>
chip_gen: v7x
topology: tpu7x:2x2x1
jax: 0.10.0
libtpu: 0.0.40
codegen_flags: <defaults>
</compile_context>

<pallas_src>
import functools

import jax
import jax.numpy as jnp
from jax.experimental import pallas as pl
from jax.experimental.pallas import tpu as pltpu

# ----------------------------- synthetic "SweBERT" config (small) -----------
VOCAB = 64
HIDDEN = 128          # (real SweBERT uses 768; scaled down, lane-aligned)
NUM_HEADS = 4
HEAD_DIM = HIDDEN // NUM_HEADS
INTERMEDIATE = 256
NUM_LAYERS = 2
NUM_LABELS = 5
NUM_LABELS_PAD = 128  # lane-dense padded classifier width (sliced back in JAX)
MAX_POS = 16
LN_EPS = 1e-12
IGNORE_INDEX = -100
NEG_BIG = -1e30


def _layernorm(x, g, b):
    mu = jnp.mean(x, axis=-1, keepdims=True)
    var = jnp.mean((x - mu) ** 2, axis=-1, keepdims=True)
    return (x - mu) * jax.lax.rsqrt(var + LN_EPS) * g + b


# ----------------------------- fused kernel ----------------------------------
def fused_forward_kernel(
        ids_ref, bias_ref, labels_ref,
        word_emb_ref, pos_type_ref, emb_g_ref, emb_b_ref,
        wqkv_ref, bqkv_ref, wo_ref, bo_ref, ln1g_ref, ln1b_ref,
        w1_ref, b1_ref, w2_ref, b2_ref, ln2g_ref, ln2b_ref,
        cls_w_ref, cls_b_ref,
        logits_ref, loss_ref,
        x_ref,
        *, batch, seq, num_heads, head_dim, hidden, vocab, num_labels):
    l = pl.program_id(0)
    bs = batch * seq

    # ---------------- embeddings (first grid step only) ----------------------
    @pl.when(l == 0)
    def _embed():
        ids = ids_ref[...]                                       # (BS, 1) int32
        # TODO(synk): one-hot matmul gather is fine at VOCAB=64; use a
        # scalar-prefetch / DMA row gather for real (~50k) vocabularies.
        onehot = (jax.lax.broadcasted_iota(jnp.int32, (bs, vocab), 1)
                  == ids).astype(jnp.float32)                    # (BS, V)
        emb = jnp.dot(onehot, word_emb_ref[...],
                      preferred_element_type=jnp.float32)        # (BS, H)
        emb = (emb.reshape(batch, seq, hidden)
               + pos_type_ref[...][None]).reshape(bs, hidden)
        x_ref[...] = _layernorm(emb, emb_g_ref[...], emb_b_ref[...])

    # ---------------- encoder layer l ----------------------------------------
    x = x_ref[...]                                               # (BS, H) f32
    x_bf = x.astype(jnp.bfloat16)

    # fused QKV projection: one lane-dense (H, 3H) matmul
    qkv = jnp.dot(x_bf, wqkv_ref[...],
                  preferred_element_type=jnp.float32) + bqkv_ref[...]
    scale = 1.0 / (head_dim ** 0.5)
    q = qkv[:, 0:hidden] * scale                                 # pre-scale once
    k = qkv[:, hidden:2 * hidden]
    v = qkv[:, 2 * hidden:3 * hidden]

    q3 = q.reshape(batch, seq, hidden)
    k3 = k.reshape(batch, seq, hidden)
    v3 = v.reshape(batch, seq, hidden)
    bias3 = bias_ref[...][:, None, :]                            # (B, 1, S) f32

    # Per-head attention via static lane-slices (no sublane transposes);
    # contexts kept in registers and concatenated lane-wise at the end.
    ctx_parts = []
    for h in range(num_heads):                                   # 4 static iters
        c0 = h * head_dim
        qh = q3[:, :, c0:c0 + head_dim].astype(jnp.bfloat16)
        kh = k3[:, :, c0:c0 + head_dim].astype(jnp.bfloat16)
        vh = v3[:, :, c0:c0 + head_dim].astype(jnp.bfloat16)
        s = jnp.einsum('bqd,bkd->bqk', qh, kh,
                       preferred_element_type=jnp.float32)       # (B, S, S) f32
        s = s + bias3                                            # additive mask
        s = s - jnp.max(s, axis=-1, keepdims=True)
        p = jnp.exp(s)
        p = p * pl.reciprocal(jnp.sum(p, axis=-1, keepdims=True), approx=True)
        ctx_parts.append(
            jnp.einsum('bqk,bkd->bqd', p.astype(jnp.bfloat16), vh,
                       preferred_element_type=jnp.float32))
    ctx = jnp.concatenate(ctx_parts, axis=-1).reshape(bs, hidden)

    attn = jnp.dot(ctx.astype(jnp.bfloat16), wo_ref[...],
                   preferred_element_type=jnp.float32) + bo_ref[...]
    h1 = _layernorm(x + attn, ln1g_ref[...], ln1b_ref[...])
    ff = jnp.dot(h1.astype(jnp.bfloat16), w1_ref[...],
                 preferred_element_type=jnp.float32) + b1_ref[...]
    # TODO(synk): HF BERT uses exact erf GELU; tanh approximation used here.
    ff = jax.nn.gelu(ff, approximate=True)
    ff = jnp.dot(ff.astype(jnp.bfloat16), w2_ref[...],
                 preferred_element_type=jnp.float32) + b2_ref[...]
    x_new = _layernorm(h1 + ff, ln2g_ref[...], ln2b_ref[...])
    x_ref[...] = x_new

    # ---------------- classifier + CE loss (last grid step only) -------------
    @pl.when(l == pl.num_programs(0) - 1)
    def _classify():
        # dropout(0.1) before the classifier is identity at inference time.
        logits = jnp.dot(x_new, cls_w_ref[...],
                         preferred_element_type=jnp.float32) + cls_b_ref[...]
        logits_ref[...] = logits                                 # (BS, 128) dense

        labels = labels_ref[...]                                 # (BS, 1) int32
        col = jax.lax.broadcasted_iota(jnp.int32, logits.shape, 1)
        masked = jnp.where(col < num_labels, logits, NEG_BIG)    # ignore padding
        m = jnp.max(masked, axis=-1, keepdims=True)
        lse = m + jnp.log(jnp.sum(jnp.exp(masked - m), axis=-1, keepdims=True))
        logp = masked - lse
        onehot = (col == labels).astype(jnp.float32)             # 0 rows for -100
        per_row = -jnp.sum(onehot * logp, axis=-1, keepdims=True)  # (BS, 1)
        valid = (labels != IGNORE_INDEX).astype(jnp.float32)     # (BS, 1)
        num = jnp.sum(per_row * valid, axis=0, keepdims=True)    # (1, 1)
        den = jnp.sum(valid, axis=0, keepdims=True)              # (1, 1)
        loss_ref[...] = num / den


# ----------------------------- wrapper ---------------------------------------
def swebert_token_classifier_forward(params, input_ids, attention_mask,
                                     labels=None):
    B, S = input_ids.shape
    BS = B * S
    H = HIDDEN
    L = NUM_LAYERS

    ids2 = input_ids.reshape(BS, 1).astype(jnp.int32)
    have_labels = labels is not None
    labels2 = (labels.reshape(BS, 1).astype(jnp.int32) if have_labels
               else jnp.zeros((BS, 1), jnp.int32))

    # BERT extended attention mask: additive (1 - mask) * -10000 (kept f32)
    bias = (1.0 - attention_mask.astype(jnp.float32)) * -10000.0   # (B, S)
    # positional + token-type embeddings (token_type_ids == 0), NOT pre-broadcast
    pos_type = params["pos_emb"][:S] + params["type_emb"]          # (S, H)

    def stack(name):
        return jnp.stack([lyr[name] for lyr in params["layers"]], axis=0)

    # fused QKV weight (L, H, 3H) + stacked per-layer weights, bf16 matmul inputs
    wqkv = jnp.concatenate([stack("wq"), stack("wk"), stack("wv")],
                           axis=-1).astype(jnp.bfloat16)
    bqkv = jnp.concatenate([stack("bq"), stack("bk"), stack("bv")], axis=-1)
    wo = stack("wo").astype(jnp.bfloat16)
    bo = stack("bo")
    ln1g, ln1b = stack("ln1_g"), stack("ln1_b")
    w1 = stack("w1").astype(jnp.bfloat16)
    b1 = stack("b1")
    w2 = stack("w2").astype(jnp.bfloat16)
    b2 = stack("b2")
    ln2g, ln2b = stack("ln2_g"), stack("ln2_b")

    # lane-dense padded classifier (pad 5 -> 128 columns; sliced back below)
    cls_w = jnp.zeros((H, NUM_LABELS_PAD),
                      jnp.float32).at[:, :NUM_LABELS].set(params["cls_w"])
    cls_b = jnp.zeros((1, NUM_LABELS_PAD),
                      jnp.float32).at[:, :NUM_LABELS].set(params["cls_b"])

    def rep(shape):                       # whole-array block, constant index
        zeros = (0,) * len(shape)
        return pl.BlockSpec(shape, lambda l, _z=zeros: _z)

    def per_layer(shape_tail):            # stacked along leading layer dim
        zeros = (0,) * len(shape_tail)
        return pl.BlockSpec((None,) + shape_tail, lambda l, _z=zeros: (l,) + _z)

    in_specs = [
        rep((BS, 1)),                     # ids
        rep((B, S)),                      # additive attention bias
        rep((BS, 1)),                     # labels
        rep((VOCAB, H)),                  # word embedding table
        rep((S, H)),                      # pos+type embeddings
        rep((1, H)), rep((1, H)),         # embedding LayerNorm g, b
        per_layer((H, 3 * H)), per_layer((1, 3 * H)),              # wqkv, bqkv
        per_layer((H, H)), per_layer((1, H)),                      # wo, bo
        per_layer((1, H)), per_layer((1, H)),                      # ln1 g, b
        per_layer((H, INTERMEDIATE)), per_layer((1, INTERMEDIATE)),  # w1, b1
        per_layer((INTERMEDIATE, H)), per_layer((1, H)),           # w2, b2
        per_layer((1, H)), per_layer((1, H)),                      # ln2 g, b
        rep((H, NUM_LABELS_PAD)), rep((1, NUM_LABELS_PAD)),        # classifier
    ]
    out_shape = (jax.ShapeDtypeStruct((BS, NUM_LABELS_PAD), jnp.float32),
                 jax.ShapeDtypeStruct((1, 1), jnp.float32))
    out_specs = (rep((BS, NUM_LABELS_PAD)), rep((1, 1)))

    grid_spec = pltpu.PrefetchScalarGridSpec(
        num_scalar_prefetch=0,
        grid=(L,),
        in_specs=in_specs,
        out_specs=out_specs,
        scratch_shapes=[pltpu.VMEM((BS, H), jnp.float32)],  # resident hidden state
    )

    kernel = functools.partial(
        fused_forward_kernel, batch=B, seq=S, num_heads=NUM_HEADS,
        head_dim=HEAD_DIM, hidden=H, vocab=VOCAB, num_labels=NUM_LABELS)

    logits_pad, loss_arr = pl.pallas_call(
        kernel,
        out_shape=out_shape,
        grid_spec=grid_spec,
        compiler_params=pltpu.CompilerParams(
            dimension_semantics=("arbitrary",)),
    )(ids2, bias, labels2,
      params["word_emb"], pos_type, params["emb_ln_g"], params["emb_ln_b"],
      wqkv, bqkv, wo, bo, ln1g, ln1b, w1, b1, w2, b2, ln2g, ln2b,
      cls_w, cls_b)

    logits = logits_pad[:, :NUM_LABELS].reshape(B, S, NUM_LABELS)
    loss = loss_arr[0, 0] if have_labels else None
    # TODO(synk): hidden_states / attentions of TokenClassifierOutput not returned.
    return loss, logits


# ----------------------------- deterministic param init ----------------------
def init_params(key):
    keys = iter(jax.random.split(key, 64))

    def nrm(shape):
        return jax.random.normal(next(keys), shape, jnp.float32) * 0.02

    params = {
        "word_emb": nrm((VOCAB, HIDDEN)),
        "pos_emb": nrm((MAX_POS, HIDDEN)),
        "type_emb": nrm((1, HIDDEN)),
        "emb_ln_g": jnp.ones((1, HIDDEN), jnp.float32),
        "emb_ln_b": jnp.zeros((1, HIDDEN), jnp.float32),
        "cls_w": nrm((HIDDEN, NUM_LABELS)),
        "cls_b": jnp.zeros((1, NUM_LABELS), jnp.float32),
        "layers": [],
    }
    for _ in range(NUM_LAYERS):
        params["layers"].append({
            "wq": nrm((HIDDEN, HIDDEN)), "bq": jnp.zeros((1, HIDDEN), jnp.float32),
            "wk": nrm((HIDDEN, HIDDEN)), "bk": jnp.zeros((1, HIDDEN), jnp.float32),
            "wv": nrm((HIDDEN, HIDDEN)), "bv": jnp.zeros((1, HIDDEN), jnp.float32),
            "wo": nrm((HIDDEN, HIDDEN)), "bo": jnp.zeros((1, HIDDEN), jnp.float32),
            "ln1_g": jnp.ones((1, HIDDEN), jnp.float32),
            "ln1_b": jnp.zeros((1, HIDDEN), jnp.float32),
            "w1": nrm((HIDDEN, INTERMEDIATE)),
            "b1": jnp.zeros((1, INTERMEDIATE), jnp.float32),
            "w2": nrm((INTERMEDIATE, HIDDEN)),
            "b2": jnp.zeros((1, HIDDEN), jnp.float32),
            "ln2_g": jnp.ones((1, HIDDEN), jnp.float32),
            "ln2_b": jnp.zeros((1, HIDDEN), jnp.float32),
        })
    return params


if __name__ == "__main__":
    key = jax.random.PRNGKey(0)
    pkey, ikey, lkey = jax.random.split(key, 3)
    params = init_params(pkey)

    B, S = 2, 8
    input_ids = jax.random.randint(ikey, (B, S), 0, VOCAB, dtype=jnp.int32)
    attention_mask = jnp.ones((B, S), jnp.int32).at[1, -1].set(0)
    labels = jax.random.randint(lkey, (B, S), 0, NUM_LABELS, dtype=jnp.int32)
    labels = labels.at[1, -1].set(IGNORE_INDEX)   # exercise ignore_index=-100

    loss, logits = swebert_token_classifier_forward(
        params, input_ids, attention_mask, labels)
    jax.block_until_ready((loss, logits))
    assert logits.shape == (B, S, NUM_LABELS)
    assert loss.shape == ()
    assert bool(jnp.isfinite(loss))
    print("KERNEL_OK")
</pallas_src>

<mosaic_0001>
module attributes {stable_mosaic.version = 11 : i64} {
  func.func @fused_forward_kernel(%arg0: i32, %arg1: memref<16x1xi32, #tpu.memory_space<vmem>>, %arg2: memref<2x8xf32, #tpu.memory_space<vmem>>, %arg3: memref<16x1xi32, #tpu.memory_space<vmem>>, %arg4: memref<64x128xf32, #tpu.memory_space<vmem>>, %arg5: memref<8x128xf32, #tpu.memory_space<vmem>>, %arg6: memref<1x128xf32, #tpu.memory_space<vmem>>, %arg7: memref<1x128xf32, #tpu.memory_space<vmem>>, %arg8: memref<1x128x384xbf16, #tpu.memory_space<vmem>>, %arg9: memref<1x1x384xf32, #tpu.memory_space<vmem>>, %arg10: memref<1x128x128xbf16, #tpu.memory_space<vmem>>, %arg11: memref<1x1x128xf32, #tpu.memory_space<vmem>>, %arg12: memref<1x1x128xf32, #tpu.memory_space<vmem>>, %arg13: memref<1x1x128xf32, #tpu.memory_space<vmem>>, %arg14: memref<1x128x256xbf16, #tpu.memory_space<vmem>>, %arg15: memref<1x1x256xf32, #tpu.memory_space<vmem>>, %arg16: memref<1x256x128xbf16, #tpu.memory_space<vmem>>, %arg17: memref<1x1x128xf32, #tpu.memory_space<vmem>>, %arg18: memref<1x1x128xf32, #tpu.memory_space<vmem>>, %arg19: memref<1x1x128xf32, #tpu.memory_space<vmem>>, %arg20: memref<128x128xf32, #tpu.memory_space<vmem>>, %arg21: memref<1x128xf32, #tpu.memory_space<vmem>>, %arg22: memref<16x128xf32, #tpu.memory_space<vmem>>, %arg23: memref<1x1xf32, #tpu.memory_space<vmem>>, %arg24: memref<16x128xf32, #tpu.memory_space<vmem>>) attributes {dimension_semantics = [#tpu.dimension_semantics<arbitrary>], iteration_bounds = array<i64: 2>, scalar_prefetch = 0 : i64, scratch_operands = 1 : i64, tpu.core_type = #tpu.core_type<tc>, window_params = [{pipeline_mode = #tpu.pipeline_mode<synchronous>, transform_indices = @transform_0, window_bounds = array<i64: 16, 1>}, {pipeline_mode = #tpu.pipeline_mode<synchronous>, transform_indices = @transform_1, window_bounds = array<i64: 2, 8>}, {pipeline_mode = #tpu.pipeline_mode<synchronous>, transform_indices = @transform_2, window_bounds = array<i64: 16, 1>}, {pipeline_mode = #tpu.pipeline_mode<synchronous>, transform_indices = @transform_3, window_bounds = array<i64: 64, 128>}, {pipeline_mode = #tpu.pipeline_mode<synchronous>, transform_indices = @transform_4, window_bounds = array<i64: 8, 128>}, {pipeline_mode = #tpu.pipeline_mode<synchronous>, transform_indices = @transform_5, window_bounds = array<i64: 1, 128>}, {pipeline_mode = #tpu.pipeline_mode<synchronous>, transform_indices = @transform_6, window_bounds = array<i64: 1, 128>}, {transform_indices = @transform_7, window_bounds = array<i64: 1, 128, 384>}, {transform_indices = @transform_8, window_bounds = array<i64: 1, 1, 384>}, {transform_indices = @transform_9, window_bounds = array<i64: 1, 128, 128>}, {transform_indices = @transform_10, window_bounds = array<i64: 1, 1, 128>}, {transform_indices = @transform_11, window_bounds = array<i64: 1, 1, 128>}, {transform_indices = @transform_12, window_bounds = array<i64: 1, 1, 128>}, {transform_indices = @transform_13, window_bounds = array<i64: 1, 128, 256>}, {transform_indices = @transform_14, window_bounds = array<i64: 1, 1, 256>}, {transform_indices = @transform_15, window_bounds = array<i64: 1, 256, 128>}, {transform_indices = @transform_16, window_bounds = array<i64: 1, 1, 128>}, {transform_indices = @transform_17, window_bounds = array<i64: 1, 1, 128>}, {transform_indices = @transform_18, window_bounds = array<i64: 1, 1, 128>}, {pipeline_mode = #tpu.pipeline_mode<synchronous>, transform_indices = @transform_19, window_bounds = array<i64: 128, 128>}, {pipeline_mode = #tpu.pipeline_mode<synchronous>, transform_indices = @transform_20, window_bounds = array<i64: 1, 128>}, {pipeline_mode = #tpu.pipeline_mode<synchronous>, transform_indices = @transform_21, window_bounds = array<i64: 16, 128>}, {pipeline_mode = #tpu.pipeline_mode<synchronous>, transform_indices = @transform_22, window_bounds = array<i64: 1, 1>}]} {
    %c0_i32 = arith.constant 0 : i32
    %0 = arith.cmpi eq, %arg0, %c0_i32 : i32
    %1 = arith.extui %0 : i1 to i32
    %c0_i32_0 = arith.constant 0 : i32
    %2 = arith.cmpi ne, %1, %c0_i32_0 : i32
    scf.if %2 {
      %c0_77 = arith.constant 0 : index
      %c0_78 = arith.constant 0 : index
      %203 = vector.load %arg1[%c0_77, %c0_78] : memref<16x1xi32, #tpu.memory_space<vmem>>, vector<16x1xi32>
      %204 = tpu.iota {dimensions = array<i32: 1>} : vector<16x64xi32>
      %205 = vector.broadcast %203 : vector<16x1xi32> to vector<16x64xi32>
      %206 = arith.cmpi eq, %204, %205 : vector<16x64xi32>
      %207 = arith.extui %206 : vector<16x64xi1> to vector<16x64xi32>
      %208 = arith.sitofp %207 : vector<16x64xi32> to vector<16x64xf32>
      %c0_79 = arith.constant 0 : index
      %c0_80 = arith.constant 0 : index
      %209 = vector.load %arg4[%c0_79, %c0_80] : memref<64x128xf32, #tpu.memory_space<vmem>>, vector<64x128xf32>
      %cst_81 = arith.constant dense<0.000000e+00> : vector<16x128xf32>
      %210 = tpu.matmul %208, %209, %cst_81 {dimension_numbers = #tpu.dot_dimension_numbers<[1], [0], [0], [1], [0, 0, 1, 1], [], []>} : vector<16x64xf32>, vector<64x128xf32>, vector<16x128xf32> -> vector<16x128xf32>
      %211 = vector.shape_cast %210 : vector<16x128xf32> to vector<2x8x128xf32>
      %c0_82 = arith.constant 0 : index
      %c0_83 = arith.constant 0 : index
      %212 = vector.load %arg5[%c0_82, %c0_83] : memref<8x128xf32, #tpu.memory_space<vmem>>, vector<8x128xf32>
      %213 = vector.shape_cast %212 : vector<8x128xf32> to vector<1x8x128xf32>
      %214 = vector.broadcast %213 : vector<1x8x128xf32> to vector<2x8x128xf32>
      %215 = arith.addf %211, %214 : vector<2x8x128xf32>
      %216 = vector.shape_cast %215 : vector<2x8x128xf32> to vector<16x128xf32>
      %c0_84 = arith.constant 0 : index
      %c0_85 = arith.constant 0 : index
      %217 = vector.load %arg6[%c0_84, %c0_85] : memref<1x128xf32, #tpu.memory_space<vmem>>, vector<1x128xf32>
      %c0_86 = arith.constant 0 : index
      %c0_87 = arith.constant 0 : index
      %218 = vector.load %arg7[%c0_86, %c0_87] : memref<1x128xf32, #tpu.memory_space<vmem>>, vector<1x128xf32>
      %cst_88 = arith.constant dense<0.000000e+00> : vector<16xf32>
      %219 = vector.multi_reduction <add>, %216, %cst_88 [1] : vector<16x128xf32> to vector<16xf32>
      %220 = vector.shape_cast %219 : vector<16xf32> to vector<16x1xf32>
      %cst_89 = arith.constant 1.280000e+02 : f32
      %221 = vector.broadcast %cst_89 : f32 to vector<16x1xf32>
      %222 = arith.divf %220, %221 : vector<16x1xf32>
      %223 = vector.broadcast %222 : vector<16x1xf32> to vector<16x128xf32>
      %224 = arith.subf %216, %223 : vector<16x128xf32>
      %225 = arith.mulf %224, %224 : vector<16x128xf32>
      %cst_90 = arith.constant dense<0.000000e+00> : vector<16xf32>
      %226 = vector.multi_reduction <add>, %225, %cst_90 [1] : vector<16x128xf32> to vector<16xf32>
      %227 = vector.shape_cast %226 : vector<16xf32> to vector<16x1xf32>
      %cst_91 = arith.constant 1.280000e+02 : f32
      %228 = vector.broadcast %cst_91 : f32 to vector<16x1xf32>
      %229 = arith.divf %227, %228 : vector<16x1xf32>
      %230 = vector.broadcast %222 : vector<16x1xf32> to vector<16x128xf32>
      %231 = arith.subf %216, %230 : vector<16x128xf32>
      %cst_92 = arith.constant 9.99999996E-13 : f32
      %232 = vector.broadcast %cst_92 : f32 to vector<16x1xf32>
      %233 = arith.addf %229, %232 : vector<16x1xf32>
      %234 = math.rsqrt %233 : vector<16x1xf32>
      %235 = vector.broadcast %234 : vector<16x1xf32> to vector<16x128xf32>
      %236 = arith.mulf %231, %235 : vector<16x128xf32>
      %237 = vector.broadcast %217 : vector<1x128xf32> to vector<16x128xf32>
      %238 = arith.mulf %236, %237 : vector<16x128xf32>
      %239 = vector.broadcast %218 : vector<1x128xf32> to vector<16x128xf32>
      %240 = arith.addf %238, %239 : vector<16x128xf32>
      %c0_93 = arith.constant 0 : index
      %c0_94 = arith.constant 0 : index
      %241 = vector.load %arg24[%c0_93, %c0_94] : memref<16x128xf32, #tpu.memory_space<vmem>>, vector<16x128xf32>
      tpu.vector_store %arg24[%c0_93, %c0_94], %240 {strides = array<i32>} : memref<16x128xf32, #tpu.memory_space<vmem>>, vector<16x128xf32>,
    } else {
    }
    %c0 = arith.constant 0 : index
    %c0_1 = arith.constant 0 : index
    %3 = vector.load %arg24[%c0, %c0_1] : memref<16x128xf32, #tpu.memory_space<vmem>>, vector<16x128xf32>
    %4 = arith.truncf %3 : vector<16x128xf32> to vector<16x128xbf16>
    %c0_2 = arith.constant 0 : index
    %c0_3 = arith.constant 0 : index
    %c0_4 = arith.constant 0 : index
    %5 = vector.load %arg8[%c0_2, %c0_3, %c0_4] : memref<1x128x384xbf16, #tpu.memory_space<vmem>>, vector<1x128x384xbf16>
    %6 = vector.shape_cast %5 : vector<1x128x384xbf16> to vector<128x384xbf16>
    %cst = arith.constant dense<0.000000e+00> : vector<16x384xf32>
    %7 = tpu.matmul %4, %6, %cst {dimension_numbers = #tpu.dot_dimension_numbers<[1], [0], [0], [1], [0, 0, 1, 1], [], []>} : vector<16x128xbf16>, vector<128x384xbf16>, vector<16x384xf32> -> vector<16x384xf32>
    %c0_5 = arith.constant 0 : index
    %c0_6 = arith.constant 0 : index
    %c0_7 = arith.constant 0 : index
    %8 = vector.load %arg9[%c0_5, %c0_6, %c0_7] : memref<1x1x384xf32, #tpu.memory_space<vmem>>, vector<1x1x384xf32>
    %9 = vector.shape_cast %8 : vector<1x1x384xf32> to vector<1x384xf32>
    %10 = vector.broadcast %9 : vector<1x384xf32> to vector<16x384xf32>
    %11 = arith.addf %7, %10 : vector<16x384xf32>
    %12 = vector.extract_strided_slice %11 {offsets = [0, 0], sizes = [16, 128], strides = [1, 1]} : vector<16x384xf32> to vector<16x128xf32>
    %cst_8 = arith.constant 0.176776692 : f32
    %13 = vector.broadcast %cst_8 : f32 to vector<16x128xf32>
    %14 = arith.mulf %12, %13 : vector<16x128xf32>
    %15 = vector.extract_strided_slice %11 {offsets = [0, 128], sizes = [16, 128], strides = [1, 1]} : vector<16x384xf32> to vector<16x128xf32>
    %16 = vector.extract_strided_slice %11 {offsets = [0, 256], sizes = [16, 128], strides = [1, 1]} : vector<16x384xf32> to vector<16x128xf32>
    %17 = vector.shape_cast %14 : vector<16x128xf32> to vector<2x8x128xf32>
    %18 = vector.shape_cast %15 : vector<16x128xf32> to vector<2x8x128xf32>
    %19 = vector.shape_cast %16 : vector<16x128xf32> to vector<2x8x128xf32>
    %c0_9 = arith.constant 0 : index
    %c0_10 = arith.constant 0 : index
    %20 = vector.load %arg2[%c0_9, %c0_10] : memref<2x8xf32, #tpu.memory_space<vmem>>, vector<2x8xf32>
    %21 = vector.shape_cast %20 : vector<2x8xf32> to vector<2x1x8xf32>
    %22 = vector.extract_strided_slice %17 {offsets = [0, 0, 0], sizes = [2, 8, 32], strides = [1, 1, 1]} : vector<2x8x128xf32> to vector<2x8x32xf32>
    %23 = arith.truncf %22 : vector<2x8x32xf32> to vector<2x8x32xbf16>
    %24 = vector.extract_strided_slice %18 {offsets = [0, 0, 0], sizes = [2, 8, 32], strides = [1, 1, 1]} : vector<2x8x128xf32> to vector<2x8x32xf32>
    %25 = arith.truncf %24 : vector<2x8x32xf32> to vector<2x8x32xbf16>
    %26 = vector.extract_strided_slice %19 {offsets = [0, 0, 0], sizes = [2, 8, 32], strides = [1, 1, 1]} : vector<2x8x128xf32> to vector<2x8x32xf32>
    %27 = arith.truncf %26 : vector<2x8x32xf32> to vector<2x8x32xbf16>
    "tpu.trace_start"() <{level = 10 : i32, message = "bqd,bkd->bqk"}> : () -> ()
    %cst_11 = arith.constant dense<0.000000e+00> : vector<2x8x8xf32>
    %28 = tpu.matmul %23, %25, %cst_11 {dimension_numbers = #tpu.dot_dimension_numbers<[2], [2], [1], [1], [0, 0, 0, 1, 1, 1], [0], [0]>} : vector<2x8x32xbf16>, vector<2x8x32xbf16>, vector<2x8x8xf32> -> vector<2x8x8xf32>
    "tpu.trace_stop"() : () -> ()
    %29 = vector.broadcast %21 : vector<2x1x8xf32> to vector<2x8x8xf32>
    %30 = arith.addf %28, %29 : vector<2x8x8xf32>
    %cst_12 = arith.constant dense<0xFF800000> : vector<2x8xf32>
    %31 = vector.multi_reduction <maximumf>, %30, %cst_12 [2] : vector<2x8x8xf32> to vector<2x8xf32>
    %32 = vector.shape_cast %31 : vector<2x8xf32> to vector<2x8x1xf32>
    %33 = vector.broadcast %32 : vector<2x8x1xf32> to vector<2x8x8xf32>
    %34 = arith.subf %30, %33 : vector<2x8x8xf32>
    %35 = math.exp %34 : vector<2x8x8xf32>
    %cst_13 = arith.constant dense<0.000000e+00> : vector<2x8xf32>
    %36 = vector.multi_reduction <add>, %35, %cst_13 [2] : vector<2x8x8xf32> to vector<2x8xf32>
    %37 = vector.shape_cast %36 : vector<2x8xf32> to vector<2x8x1xf32>
    %38 = tpu.reciprocal %37 {approx = true} : vector<2x8x1xf32> -> vector<2x8x1xf32>
    %39 = vector.broadcast %38 : vector<2x8x1xf32> to vector<2x8x8xf32>
    %40 = arith.mulf %35, %39 : vector<2x8x8xf32>
    %41 = arith.truncf %40 : vector<2x8x8xf32> to vector<2x8x8xbf16>
    "tpu.trace_start"() <{level = 10 : i32, message = "bqk,bkd->bqd"}> : () -> ()
    %cst_14 = arith.constant dense<0.000000e+00> : vector<2x8x32xf32>
    %42 = tpu.matmul %41, %27, %cst_14 {dimension_numbers = #tpu.dot_dimension_numbers<[2], [1], [1], [2], [0, 0, 0, 1, 1, 2], [0], [0]>} : vector<2x8x8xbf16>, vector<2x8x32xbf16>, vector<2x8x32xf32> -> vector<2x8x32xf32>
    "tpu.trace_stop"() : () -> ()
    %43 = vector.extract_strided_slice %17 {offsets = [0, 0, 32], sizes = [2, 8, 32], strides = [1, 1, 1]} : vector<2x8x128xf32> to vector<2x8x32xf32>
    %44 = arith.truncf %43 : vector<2x8x32xf32> to vector<2x8x32xbf16>
    %45 = vector.extract_strided_slice %18 {offsets = [0, 0, 32], sizes = [2, 8, 32], strides = [1, 1, 1]} : vector<2x8x128xf32> to vector<2x8x32xf32>
    %46 = arith.truncf %45 : vector<2x8x32xf32> to vector<2x8x32xbf16>
    %47 = vector.extract_strided_slice %19 {offsets = [0, 0, 32], sizes = [2, 8, 32], strides = [1, 1, 1]} : vector<2x8x128xf32> to vector<2x8x32xf32>
    %48 = arith.truncf %47 : vector<2x8x32xf32> to vector<2x8x32xbf16>
    "tpu.trace_start"() <{level = 10 : i32, message = "bqd,bkd->bqk"}> : () -> ()
    %cst_15 = arith.constant dense<0.000000e+00> : vector<2x8x8xf32>
    %49 = tpu.matmul %44, %46, %cst_15 {dimension_numbers = #tpu.dot_dimension_numbers<[2], [2], [1], [1], [0, 0, 0, 1, 1, 1], [0], [0]>} : vector<2x8x32xbf16>, vector<2x8x32xbf16>, vector<2x8x8xf32> -> vector<2x8x8xf32>
    "tpu.trace_stop"() : () -> ()
    %50 = vector.broadcast %21 : vector<2x1x8xf32> to vector<2x8x8xf32>
    %51 = arith.addf %49, %50 : vector<2x8x8xf32>
    %cst_16 = arith.constant dense<0xFF800000> : vector<2x8xf32>
    %52 = vector.multi_reduction <maximumf>, %51, %cst_16 [2] : vector<2x8x8xf32> to vector<2x8xf32>
    %53 = vector.shape_cast %52 : vector<2x8xf32> to vector<2x8x1xf32>
    %54 = vector.broadcast %53 : vector<2x8x1xf32> to vector<2x8x8xf32>
    %55 = arith.subf %51, %54 : vector<2x8x8xf32>
    %56 = math.exp %55 : vector<2x8x8xf32>
    %cst_17 = arith.constant dense<0.000000e+00> : vector<2x8xf32>
    %57 = vector.multi_reduction <add>, %56, %cst_17 [2] : vector<2x8x8xf32> to vector<2x8xf32>
    %58 = vector.shape_cast %57 : vector<2x8xf32> to vector<2x8x1xf32>
    %59 = tpu.reciprocal %58 {approx = true} : vector<2x8x1xf32> -> vector<2x8x1xf32>
    %60 = vector.broadcast %59 : vector<2x8x1xf32> to vector<2x8x8xf32>
    %61 = arith.mulf %56, %60 : vector<2x8x8xf32>
    %62 = arith.truncf %61 : vector<2x8x8xf32> to vector<2x8x8xbf16>
    "tpu.trace_start"() <{level = 10 : i32, message = "bqk,bkd->bqd"}> : () -> ()
    %cst_18 = arith.constant dense<0.000000e+00> : vector<2x8x32xf32>
    %63 = tpu.matmul %62, %48, %cst_18 {dimension_numbers = #tpu.dot_dimension_numbers<[2], [1], [1], [2], [0, 0, 0, 1, 1, 2], [0], [0]>} : vector<2x8x8xbf16>, vector<2x8x32xbf16>, vector<2x8x32xf32> -> vector<2x8x32xf32>
    "tpu.trace_stop"() : () -> ()
    %64 = vector.extract_strided_slice %17 {offsets = [0, 0, 64], sizes = [2, 8, 32], strides = [1, 1, 1]} : vector<2x8x128xf32> to vector<2x8x32xf32>
    %65 = arith.truncf %64 : vector<2x8x32xf32> to vector<2x8x32xbf16>
    %66 = vector.extract_strided_slice %18 {offsets = [0, 0, 64], sizes = [2, 8, 32], strides = [1, 1, 1]} : vector<2x8x128xf32> to vector<2x8x32xf32>
    %67 = arith.truncf %66 : vector<2x8x32xf32> to vector<2x8x32xbf16>
    %68 = vector.extract_strided_slice %19 {offsets = [0, 0, 64], sizes = [2, 8, 32], strides = [1, 1, 1]} : vector<2x8x128xf32> to vector<2x8x32xf32>
    %69 = arith.truncf %68 : vector<2x8x32xf32> to vector<2x8x32xbf16>
    "tpu.trace_start"() <{level = 10 : i32, message = "bqd,bkd->bqk"}> : () -> ()
    %cst_19 = arith.constant dense<0.000000e+00> : vector<2x8x8xf32>
    %70 = tpu.matmul %65, %67, %cst_19 {dimension_numbers = #tpu.dot_dimension_numbers<[2], [2], [1], [1], [0, 0, 0, 1, 1, 1], [0], [0]>} : vector<2x8x32xbf16>, vector<2x8x32xbf16>, vector<2x8x8xf32> -> vector<2x8x8xf32>
    "tpu.trace_stop"() : () -> ()
    %71 = vector.broadcast %21 : vector<2x1x8xf32> to vector<2x8x8xf32>
    %72 = arith.addf %70, %71 : vector<2x8x8xf32>
    %cst_20 = arith.constant dense<0xFF800000> : vector<2x8xf32>
    %73 = vector.multi_reduction <maximumf>, %72, %cst_20 [2] : vector<2x8x8xf32> to vector<2x8xf32>
    %74 = vector.shape_cast %73 : vector<2x8xf32> to vector<2x8x1xf32>
    %75 = vector.broadcast %74 : vector<2x8x1xf32> to vector<2x8x8xf32>
    %76 = arith.subf %72, %75 : vector<2x8x8xf32>
    %77 = math.exp %76 : vector<2x8x8xf32>
    %cst_21 = arith.constant dense<0.000000e+00> : vector<2x8xf32>
    %78 = vector.multi_reduction <add>, %77, %cst_21 [2] : vector<2x8x8xf32> to vector<2x8xf32>
    %79 = vector.shape_cast %78 : vector<2x8xf32> to vector<2x8x1xf32>
    %80 = tpu.reciprocal %79 {approx = true} : vector<2x8x1xf32> -> vector<2x8x1xf32>
    %81 = vector.broadcast %80 : vector<2x8x1xf32> to vector<2x8x8xf32>
    %82 = arith.mulf %77, %81 : vector<2x8x8xf32>
    %83 = arith.truncf %82 : vector<2x8x8xf32> to vector<2x8x8xbf16>
    "tpu.trace_start"() <{level = 10 : i32, message = "bqk,bkd->bqd"}> : () -> ()
    %cst_22 = arith.constant dense<0.000000e+00> : vector<2x8x32xf32>
    %84 = tpu.matmul %83, %69, %cst_22 {dimension_numbers = #tpu.dot_dimension_numbers<[2], [1], [1], [2], [0, 0, 0, 1, 1, 2], [0], [0]>} : vector<2x8x8xbf16>, vector<2x8x32xbf16>, vector<2x8x32xf32> -> vector<2x8x32xf32>
    "tpu.trace_stop"() : () -> ()
    %85 = vector.extract_strided_slice %17 {offsets = [0, 0, 96], sizes = [2, 8, 32], strides = [1, 1, 1]} : vector<2x8x128xf32> to vector<2x8x32xf32>
    %86 = arith.truncf %85 : vector<2x8x32xf32> to vector<2x8x32xbf16>
    %87 = vector.extract_strided_slice %18 {offsets = [0, 0, 96], sizes = [2, 8, 32], strides = [1, 1, 1]} : vector<2x8x128xf32> to vector<2x8x32xf32>
    %88 = arith.truncf %87 : vector<2x8x32xf32> to vector<2x8x32xbf16>
    %89 = vector.extract_strided_slice %19 {offsets = [0, 0, 96], sizes = [2, 8, 32], strides = [1, 1, 1]} : vector<2x8x128xf32> to vector<2x8x32xf32>
    %90 = arith.truncf %89 : vector<2x8x32xf32> to vector<2x8x32xbf16>
    "tpu.trace_start"() <{level = 10 : i32, message = "bqd,bkd->bqk"}> : () -> ()
    %cst_23 = arith.constant dense<0.000000e+00> : vector<2x8x8xf32>
    %91 = tpu.matmul %86, %88, %cst_23 {dimension_numbers = #tpu.dot_dimension_numbers<[2], [2], [1], [1], [0, 0, 0, 1, 1, 1], [0], [0]>} : vector<2x8x32xbf16>, vector<2x8x32xbf16>, vector<2x8x8xf32> -> vector<2x8x8xf32>
    "tpu.trace_stop"() : () -> ()
    %92 = vector.broadcast %21 : vector<2x1x8xf32> to vector<2x8x8xf32>
    %93 = arith.addf %91, %92 : vector<2x8x8xf32>
    %cst_24 = arith.constant dense<0xFF800000> : vector<2x8xf32>
    %94 = vector.multi_reduction <maximumf>, %93, %cst_24 [2] : vector<2x8x8xf32> to vector<2x8xf32>
    %95 = vector.shape_cast %94 : vector<2x8xf32> to vector<2x8x1xf32>
    %96 = vector.broadcast %95 : vector<2x8x1xf32> to vector<2x8x8xf32>
    %97 = arith.subf %93, %96 : vector<2x8x8xf32>
    %98 = math.exp %97 : vector<2x8x8xf32>
    %cst_25 = arith.constant dense<0.000000e+00> : vector<2x8xf32>
    %99 = vector.multi_reduction <add>, %98, %cst_25 [2] : vector<2x8x8xf32> to vector<2x8xf32>
    %100 = vector.shape_cast %99 : vector<2x8xf32> to vector<2x8x1xf32>
    %101 = tpu.reciprocal %100 {approx = true} : vector<2x8x1xf32> -> vector<2x8x1xf32>
    %102 = vector.broadcast %101 : vector<2x8x1xf32> to vector<2x8x8xf32>
    %103 = arith.mulf %98, %102 : vector<2x8x8xf32>
    %104 = arith.truncf %103 : vector<2x8x8xf32> to vector<2x8x8xbf16>
    "tpu.trace_start"() <{level = 10 : i32, message = "bqk,bkd->bqd"}> : () -> ()
    %cst_26 = arith.constant dense<0.000000e+00> : vector<2x8x32xf32>
    %105 = tpu.matmul %104, %90, %cst_26 {dimension_numbers = #tpu.dot_dimension_numbers<[2], [1], [1], [2], [0, 0, 0, 1, 1, 2], [0], [0]>} : vector<2x8x8xbf16>, vector<2x8x32xbf16>, vector<2x8x32xf32> -> vector<2x8x32xf32>
    "tpu.trace_stop"() : () -> ()
    %106 = tpu.concatenate %42, %63, %84, %105 in 2 : vector<2x8x32xf32>, vector<2x8x32xf32>, vector<2x8x32xf32>, vector<2x8x32xf32> -> vector<2x8x128xf32>
    %107 = vector.shape_cast %106 : vector<2x8x128xf32> to vector<16x128xf32>
    %108 = arith.truncf %107 : vector<16x128xf32> to vector<16x128xbf16>
    %c0_27 = arith.constant 0 : index
    %c0_28 = arith.constant 0 : index
    %c0_29 = arith.constant 0 : index
    %109 = vector.load %arg10[%c0_27, %c0_28, %c0_29] : memref<1x128x128xbf16, #tpu.memory_space<vmem>>, vector<1x128x128xbf16>
    %110 = vector.shape_cast %109 : vector<1x128x128xbf16> to vector<128x128xbf16>
    %cst_30 = arith.constant dense<0.000000e+00> : vector<16x128xf32>
    %111 = tpu.matmul %108, %110, %cst_30 {dimension_numbers = #tpu.dot_dimension_numbers<[1], [0], [0], [1], [0, 0, 1, 1], [], []>} : vector<16x128xbf16>, vector<128x128xbf16>, vector<16x128xf32> -> vector<16x128xf32>
    %c0_31 = arith.constant 0 : index
    %c0_32 = arith.constant 0 : index
    %c0_33 = arith.constant 0 : index
    %112 = vector.load %arg11[%c0_31, %c0_32, %c0_33] : memref<1x1x128xf32, #tpu.memory_space<vmem>>, vector<1x1x128xf32>
    %113 = vector.shape_cast %112 : vector<1x1x128xf32> to vector<1x128xf32>
    %114 = vector.broadcast %113 : vector<1x128xf32> to vector<16x128xf32>
    %115 = arith.addf %111, %114 : vector<16x128xf32>
    %116 = arith.addf %3, %115 : vector<16x128xf32>
    %c0_34 = arith.constant 0 : index
    %c0_35 = arith.constant 0 : index
    %c0_36 = arith.constant 0 : index
    %117 = vector.load %arg12[%c0_34, %c0_35, %c0_36] : memref<1x1x128xf32, #tpu.memory_space<vmem>>, vector<1x1x128xf32>
    %118 = vector.shape_cast %117 : vector<1x1x128xf32> to vector<1x128xf32>
    %c0_37 = arith.constant 0 : index
    %c0_38 = arith.constant 0 : index
    %c0_39 = arith.constant 0 : index
    %119 = vector.load %arg13[%c0_37, %c0_38, %c0_39] : memref<1x1x128xf32, #tpu.memory_space<vmem>>, vector<1x1x128xf32>
    %120 = vector.shape_cast %119 : vector<1x1x128xf32> to vector<1x128xf32>
    %cst_40 = arith.constant dense<0.000000e+00> : vector<16xf32>
    %121 = vector.multi_reduction <add>, %116, %cst_40 [1] : vector<16x128xf32> to vector<16xf32>
    %122 = vector.shape_cast %121 : vector<16xf32> to vector<16x1xf32>
    %cst_41 = arith.constant 1.280000e+02 : f32
    %123 = vector.broadcast %cst_41 : f32 to vector<16x1xf32>
    %124 = arith.divf %122, %123 : vector<16x1xf32>
    %125 = vector.broadcast %124 : vector<16x1xf32> to vector<16x128xf32>
    %126 = arith.subf %116, %125 : vector<16x128xf32>
    %127 = arith.mulf %126, %126 : vector<16x128xf32>
    %cst_42 = arith.constant dense<0.000000e+00> : vector<16xf32>
    %128 = vector.multi_reduction <add>, %127, %cst_42 [1] : vector<16x128xf32> to vector<16xf32>
    %129 = vector.shape_cast %128 : vector<16xf32> to vector<16x1xf32>
    %cst_43 = arith.constant 1.280000e+02 : f32
    %130 = vector.broadcast %cst_43 : f32 to vector<16x1xf32>
    %131 = arith.divf %129, %130 : vector<16x1xf32>
    %132 = vector.broadcast %124 : vector<16x1xf32> to vector<16x128xf32>
    %133 = arith.subf %116, %132 : vector<16x128xf32>
    %cst_44 = arith.constant 9.99999996E-13 : f32
    %134 = vector.broadcast %cst_44 : f32 to vector<16x1xf32>
    %135 = arith.addf %131, %134 : vector<16x1xf32>
    %136 = math.rsqrt %135 : vector<16x1xf32>
    %137 = vector.broadcast %136 : vector<16x1xf32> to vector<16x128xf32>
    %138 = arith.mulf %133, %137 : vector<16x128xf32>
    %139 = vector.broadcast %118 : vector<1x128xf32> to vector<16x128xf32>
    %140 = arith.mulf %138, %139 : vector<16x128xf32>
    %141 = vector.broadcast %120 : vector<1x128xf32> to vector<16x128xf32>
    %142 = arith.addf %140, %141 : vector<16x128xf32>
    %143 = arith.truncf %142 : vector<16x128xf32> to vector<16x128xbf16>
    %c0_45 = arith.constant 0 : index
    %c0_46 = arith.constant 0 : index
    %c0_47 = arith.constant 0 : index
    %144 = vector.load %arg14[%c0_45, %c0_46, %c0_47] : memref<1x128x256xbf16, #tpu.memory_space<vmem>>, vector<1x128x256xbf16>
    %145 = vector.shape_cast %144 : vector<1x128x256xbf16> to vector<128x256xbf16>
    %cst_48 = arith.constant dense<0.000000e+00> : vector<16x256xf32>
    %146 = tpu.matmul %143, %145, %cst_48 {dimension_numbers = #tpu.dot_dimension_numbers<[1], [0], [0], [1], [0, 0, 1, 1], [], []>} : vector<16x128xbf16>, vector<128x256xbf16>, vector<16x256xf32> -> vector<16x256xf32>
    %c0_49 = arith.constant 0 : index
    %c0_50 = arith.constant 0 : index
    %c0_51 = arith.constant 0 : index
    %147 = vector.load %arg15[%c0_49, %c0_50, %c0_51] : memref<1x1x256xf32, #tpu.memory_space<vmem>>, vector<1x1x256xf32>
    %148 = vector.shape_cast %147 : vector<1x1x256xf32> to vector<1x256xf32>
    %149 = vector.broadcast %148 : vector<1x256xf32> to vector<16x256xf32>
    %150 = arith.addf %146, %149 : vector<16x256xf32>
    %151 = arith.mulf %150, %150 : vector<16x256xf32>
    %152 = arith.mulf %150, %151 : vector<16x256xf32>
    %cst_52 = arith.constant 4.471500e-02 : f32
    %153 = vector.broadcast %cst_52 : f32 to vector<16x256xf32>
    %154 = arith.mulf %153, %152 : vector<16x256xf32>
    %155 = arith.addf %150, %154 : vector<16x256xf32>
    %cst_53 = arith.constant 0.797884583 : f32
    %156 = vector.broadcast %cst_53 : f32 to vector<16x256xf32>
    %157 = arith.mulf %156, %155 : vector<16x256xf32>
    %158 = math.tanh %157 : vector<16x256xf32>
    %cst_54 = arith.constant 1.000000e+00 : f32
    %159 = vector.broadcast %cst_54 : f32 to vector<16x256xf32>
    %160 = arith.addf %159, %158 : vector<16x256xf32>
    %cst_55 = arith.constant 5.000000e-01 : f32
    %161 = vector.broadcast %cst_55 : f32 to vector<16x256xf32>
    %162 = arith.mulf %161, %160 : vector<16x256xf32>
    %163 = arith.mulf %150, %162 : vector<16x256xf32>
    %164 = arith.truncf %163 : vector<16x256xf32> to vector<16x256xbf16>
    %c0_56 = arith.constant 0 : index
    %c0_57 = arith.constant 0 : index
    %c0_58 = arith.constant 0 : index
    %165 = vector.load %arg16[%c0_56, %c0_57, %c0_58] : memref<1x256x128xbf16, #tpu.memory_space<vmem>>, vector<1x256x128xbf16>
    %166 = vector.shape_cast %165 : vector<1x256x128xbf16> to vector<256x128xbf16>
    %cst_59 = arith.constant dense<0.000000e+00> : vector<16x128xf32>
    %167 = tpu.matmul %164, %166, %cst_59 {dimension_numbers = #tpu.dot_dimension_numbers<[1], [0], [0], [1], [0, 0, 1, 1], [], []>} : vector<16x256xbf16>, vector<256x128xbf16>, vector<16x128xf32> -> vector<16x128xf32>
    %c0_60 = arith.constant 0 : index
    %c0_61 = arith.constant 0 : index
    %c0_62 = arith.constant 0 : index
    %168 = vector.load %arg17[%c0_60, %c0_61, %c0_62] : memref<1x1x128xf32, #tpu.memory_space<vmem>>, vector<1x1x128xf32>
    %169 = vector.shape_cast %168 : vector<1x1x128xf32> to vector<1x128xf32>
    %170 = vector.broadcast %169 : vector<1x128xf32> to vector<16x128xf32>
    %171 = arith.addf %167, %170 : vector<16x128xf32>
    %172 = arith.addf %142, %171 : vector<16x128xf32>
    %c0_63 = arith.constant 0 : index
    %c0_64 = arith.constant 0 : index
    %c0_65 = arith.constant 0 : index
    %173 = vector.load %arg18[%c0_63, %c0_64, %c0_65] : memref<1x1x128xf32, #tpu.memory_space<vmem>>, vector<1x1x128xf32>
    %174 = vector.shape_cast %173 : vector<1x1x128xf32> to vector<1x128xf32>
    %c0_66 = arith.constant 0 : index
    %c0_67 = arith.constant 0 : index
    %c0_68 = arith.constant 0 : index
    %175 = vector.load %arg19[%c0_66, %c0_67, %c0_68] : memref<1x1x128xf32, #tpu.memory_space<vmem>>, vector<1x1x128xf32>
    %176 = vector.shape_cast %175 : vector<1x1x128xf32> to vector<1x128xf32>
    %cst_69 = arith.constant dense<0.000000e+00> : vector<16xf32>
    %177 = vector.multi_reduction <add>, %172, %cst_69 [1] : vector<16x128xf32> to vector<16xf32>
    %178 = vector.shape_cast %177 : vector<16xf32> to vector<16x1xf32>
    %cst_70 = arith.constant 1.280000e+02 : f32
    %179 = vector.broadcast %cst_70 : f32 to vector<16x1xf32>
    %180 = arith.divf %178, %179 : vector<16x1xf32>
    %181 = vector.broadcast %180 : vector<16x1xf32> to vector<16x128xf32>
    %182 = arith.subf %172, %181 : vector<16x128xf32>
    %183 = arith.mulf %182, %182 : vector<16x128xf32>
    %cst_71 = arith.constant dense<0.000000e+00> : vector<16xf32>
    %184 = vector.multi_reduction <add>, %183, %cst_71 [1] : vector<16x128xf32> to vector<16xf32>
    %185 = vector.shape_cast %184 : vector<16xf32> to vector<16x1xf32>
    %cst_72 = arith.constant 1.280000e+02 : f32
    %186 = vector.broadcast %cst_72 : f32 to vector<16x1xf32>
    %187 = arith.divf %185, %186 : vector<16x1xf32>
    %188 = vector.broadcast %180 : vector<16x1xf32> to vector<16x128xf32>
    %189 = arith.subf %172, %188 : vector<16x128xf32>
    %cst_73 = arith.constant 9.99999996E-13 : f32
    %190 = vector.broadcast %cst_73 : f32 to vector<16x1xf32>
    %191 = arith.addf %187, %190 : vector<16x1xf32>
    %192 = math.rsqrt %191 : vector<16x1xf32>
    %193 = vector.broadcast %192 : vector<16x1xf32> to vector<16x128xf32>
    %194 = arith.mulf %189, %193 : vector<16x128xf32>
    %195 = vector.broadcast %174 : vector<1x128xf32> to vector<16x128xf32>
    %196 = arith.mulf %194, %195 : vector<16x128xf32>
    %197 = vector.broadcast %176 : vector<1x128xf32> to vector<16x128xf32>
    %198 = arith.addf %196, %197 : vector<16x128xf32>
    %c0_74 = arith.constant 0 : index
    %c0_75 = arith.constant 0 : index
    %199 = vector.load %arg24[%c0_74, %c0_75] : memref<16x128xf32, #tpu.memory_space<vmem>>, vector<16x128xf32>
    tpu.vector_store %arg24[%c0_74, %c0_75], %198 {strides = array<i32>} : memref<16x128xf32, #tpu.memory_space<vmem>>, vector<16x128xf32>,
    %c1_i32 = arith.constant 1 : i32
    %200 = arith.cmpi eq, %arg0, %c1_i32 : i32
    %201 = arith.extui %200 : i1 to i32
    %c0_i32_76 = arith.constant 0 : i32
    %202 = arith.cmpi ne, %201, %c0_i32_76 : i32
    scf.if %202 {
      %c0_77 = arith.constant 0 : index
      %c0_78 = arith.constant 0 : index
      %203 = vector.load %arg20[%c0_77, %c0_78] : memref<128x128xf32, #tpu.memory_space<vmem>>, vector<128x128xf32>
      %cst_79 = arith.constant dense<0.000000e+00> : vector<16x128xf32>
      %204 = tpu.matmul %198, %203, %cst_79 {dimension_numbers = #tpu.dot_dimension_numbers<[1], [0], [0], [1], [0, 0, 1, 1], [], []>} : vector<16x128xf32>, vector<128x128xf32>, vector<16x128xf32> -> vector<16x128xf32>
      %c0_80 = arith.constant 0 : index
      %c0_81 = arith.constant 0 : index
      %205 = vector.load %arg21[%c0_80, %c0_81] : memref<1x128xf32, #tpu.memory_space<vmem>>, vector<1x128xf32>
      %206 = vector.broadcast %205 : vector<1x128xf32> to vector<16x128xf32>
      %207 = arith.addf %204, %206 : vector<16x128xf32>
      %c0_82 = arith.constant 0 : index
      %c0_83 = arith.constant 0 : index
      %208 = vector.load %arg22[%c0_82, %c0_83] : memref<16x128xf32, #tpu.memory_space<vmem>>, vector<16x128xf32>
      tpu.vector_store %arg22[%c0_82, %c0_83], %207 {strides = array<i32>} : memref<16x128xf32, #tpu.memory_space<vmem>>, vector<16x128xf32>,
      %c0_84 = arith.constant 0 : index
      %c0_85 = arith.constant 0 : index
      %209 = vector.load %arg3[%c0_84, %c0_85] : memref<16x1xi32, #tpu.memory_space<vmem>>, vector<16x1xi32>
      %210 = tpu.iota {dimensions = array<i32: 1>} : vector<16x128xi32>
      %c5_i32 = arith.constant 5 : i32
      %211 = vector.broadcast %c5_i32 : i32 to vector<16x128xi32>
      %212 = arith.cmpi slt, %210, %211 : vector<16x128xi32>
      %cst_86 = arith.constant -1.000000e+30 : f32
      %213 = vector.broadcast %cst_86 : f32 to vector<16x128xf32>
      %214 = arith.select %212, %207, %213 : vector<16x128xi1>, vector<16x128xf32>
      %cst_87 = arith.constant dense<0xFF800000> : vector<16xf32>
      %215 = vector.multi_reduction <maximumf>, %214, %cst_87 [1] : vector<16x128xf32> to vector<16xf32>
      %216 = vector.shape_cast %215 : vector<16xf32> to vector<16x1xf32>
      %217 = vector.broadcast %216 : vector<16x1xf32> to vector<16x128xf32>
      %218 = arith.subf %214, %217 : vector<16x128xf32>
      %219 = math.exp %218 : vector<16x128xf32>
      %cst_88 = arith.constant dense<0.000000e+00> : vector<16xf32>
      %220 = vector.multi_reduction <add>, %219, %cst_88 [1] : vector<16x128xf32> to vector<16xf32>
      %221 = vector.shape_cast %220 : vector<16xf32> to vector<16x1xf32>
      %222 = math.log %221 : vector<16x1xf32>
      %223 = arith.addf %216, %222 : vector<16x1xf32>
      %224 = vector.broadcast %223 : vector<16x1xf32> to vector<16x128xf32>
      %225 = arith.subf %214, %224 : vector<16x128xf32>
      %226 = vector.broadcast %209 : vector<16x1xi32> to vector<16x128xi32>
      %227 = arith.cmpi eq, %210, %226 : vector<16x128xi32>
      %228 = arith.extui %227 : vector<16x128xi1> to vector<16x128xi32>
      %229 = arith.sitofp %228 : vector<16x128xi32> to vector<16x128xf32>
      %230 = arith.mulf %229, %225 : vector<16x128xf32>
      %cst_89 = arith.constant dense<0.000000e+00> : vector<16xf32>
      %231 = vector.multi_reduction <add>, %230, %cst_89 [1] : vector<16x128xf32> to vector<16xf32>
      %232 = vector.shape_cast %231 : vector<16xf32> to vector<16x1xf32>
      %cst_90 = arith.constant 0.000000e+00 : f32
      %233 = vector.broadcast %cst_90 : f32 to vector<16x1xf32>
      %234 = arith.subf %233, %232 : vector<16x1xf32>
      %c-100_i32 = arith.constant -100 : i32
      %235 = vector.broadcast %c-100_i32 : i32 to vector<16x1xi32>
      %236 = arith.cmpi ne, %209, %235 : vector<16x1xi32>
      %237 = arith.extui %236 : vector<16x1xi1> to vector<16x1xi32>
      %238 = arith.sitofp %237 : vector<16x1xi32> to vector<16x1xf32>
      %239 = arith.mulf %234, %238 : vector<16x1xf32>
      %cst_91 = arith.constant dense<0.000000e+00> : vector<1xf32>
      %240 = vector.multi_reduction <add>, %239, %cst_91 [0] : vector<16x1xf32> to vector<1xf32>
      %241 = vector.shape_cast %240 : vector<1xf32> to vector<1x1xf32>
      %cst_92 = arith.constant dense<0.000000e+00> : vector<1xf32>
      %242 = vector.multi_reduction <add>, %238, %cst_92 [0] : vector<16x1xf32> to vector<1xf32>
      %243 = vector.shape_cast %242 : vector<1xf32> to vector<1x1xf32>
      %244 = arith.divf %241, %243 : vector<1x1xf32>
      %c0_93 = arith.constant 0 : index
      %c0_94 = arith.constant 0 : index
      %245 = vector.load %arg23[%c0_93, %c0_94] : memref<1x1xf32, #tpu.memory_space<vmem>>, vector<1x1xf32>
      tpu.vector_store %arg23[%c0_93, %c0_94], %244 {strides = array<i32>} : memref<1x1xf32, #tpu.memory_space<vmem>>, vector<1x1xf32>,
    } else {
    }
    return
  }
  func.func @transform_0(%arg0: i32) -> (i32, i32) {
    %c0_i32 = arith.constant 0 : i32
    %c0_i32_0 = arith.constant 0 : i32
    %c0_i32_1 = arith.constant 0 : i32
    return %c0_i32, %c0_i32_0 : i32, i32
  }
  func.func @transform_1(%arg0: i32) -> (i32, i32) {
    %c0_i32 = arith.constant 0 : i32
    %c0_i32_0 = arith.constant 0 : i32
    %c0_i32_1 = arith.constant 0 : i32
    return %c0_i32, %c0_i32_0 : i32, i32
  }
  func.func @transform_2(%arg0: i32) -> (i32, i32) {
    %c0_i32 = arith.constant 0 : i32
    %c0_i32_0 = arith.constant 0 : i32
    %c0_i32_1 = arith.constant 0 : i32
    return %c0_i32, %c0_i32_0 : i32, i32
  }
  func.func @transform_3(%arg0: i32) -> (i32, i32) {
    %c0_i32 = arith.constant 0 : i32
    %c0_i32_0 = arith.constant 0 : i32
    %c0_i32_1 = arith.constant 0 : i32
    return %c0_i32, %c0_i32_0 : i32, i32
  }
  func.func @transform_4(%arg0: i32) -> (i32, i32) {
    %c0_i32 = arith.constant 0 : i32
    %c0_i32_0 = arith.constant 0 : i32
    %c0_i32_1 = arith.constant 0 : i32
    return %c0_i32, %c0_i32_0 : i32, i32
  }
  func.func @transform_5(%arg0: i32) -> (i32, i32) {
    %c0_i32 = arith.constant 0 : i32
    %c0_i32_0 = arith.constant 0 : i32
    %c0_i32_1 = arith.constant 0 : i32
    return %c0_i32, %c0_i32_0 : i32, i32
  }
  func.func @transform_6(%arg0: i32) -> (i32, i32) {
    %c0_i32 = arith.constant 0 : i32
    %c0_i32_0 = arith.constant 0 : i32
    %c0_i32_1 = arith.constant 0 : i32
    return %c0_i32, %c0_i32_0 : i32, i32
  }
  func.func @transform_7(%arg0: i32) -> (i32, i32, i32) {
    %c0_i32 = arith.constant 0 : i32
    %c0_i32_0 = arith.constant 0 : i32
    %c0_i32_1 = arith.constant 0 : i32
    return %arg0, %c0_i32, %c0_i32_0 : i32, i32, i32
  }
  func.func @transform_8(%arg0: i32) -> (i32, i32, i32) {
    %c0_i32 = arith.constant 0 : i32
    %c0_i32_0 = arith.constant 0 : i32
    %c0_i32_1 = arith.constant 0 : i32
    return %arg0, %c0_i32, %c0_i32_0 : i32, i32, i32
  }
  func.func @transform_9(%arg0: i32) -> (i32, i32, i32) {
    %c0_i32 = arith.constant 0 : i32
    %c0_i32_0 = arith.constant 0 : i32
    %c0_i32_1 = arith.constant 0 : i32
    return %arg0, %c0_i32, %c0_i32_0 : i32, i32, i32
  }
  func.func @transform_10(%arg0: i32) -> (i32, i32, i32) {
    %c0_i32 = arith.constant 0 : i32
    %c0_i32_0 = arith.constant 0 : i32
    %c0_i32_1 = arith.constant 0 : i32
    return %arg0, %c0_i32, %c0_i32_0 : i32, i32, i32
  }
  func.func @transform_11(%arg0: i32) -> (i32, i32, i32) {
    %c0_i32 = arith.constant 0 : i32
    %c0_i32_0 = arith.constant 0 : i32
    %c0_i32_1 = arith.constant 0 : i32
    return %arg0, %c0_i32, %c0_i32_0 : i32, i32, i32
  }
  func.func @transform_12(%arg0: i32) -> (i32, i32, i32) {
    %c0_i32 = arith.constant 0 : i32
    %c0_i32_0 = arith.constant 0 : i32
    %c0_i32_1 = arith.constant 0 : i32
    return %arg0, %c0_i32, %c0_i32_0 : i32, i32, i32
  }
  func.func @transform_13(%arg0: i32) -> (i32, i32, i32) {
    %c0_i32 = arith.constant 0 : i32
    %c0_i32_0 = arith.constant 0 : i32
    %c0_i32_1 = arith.constant 0 : i32
    return %arg0, %c0_i32, %c0_i32_0 : i32, i32, i32
  }
  func.func @transform_14(%arg0: i32) -> (i32, i32, i32) {
    %c0_i32 = arith.constant 0 : i32
    %c0_i32_0 = arith.constant 0 : i32
    %c0_i32_1 = arith.constant 0 : i32
    return %arg0, %c0_i32, %c0_i32_0 : i32, i32, i32
  }
  func.func @transform_15(%arg0: i32) -> (i32, i32, i32) {
    %c0_i32 = arith.constant 0 : i32
    %c0_i32_0 = arith.constant 0 : i32
    %c0_i32_1 = arith.constant 0 : i32
    return %arg0, %c0_i32, %c0_i32_0 : i32, i32, i32
  }
  func.func @transform_16(%arg0: i32) -> (i32, i32, i32) {
    %c0_i32 = arith.constant 0 : i32
    %c0_i32_0 = arith.constant 0 : i32
    %c0_i32_1 = arith.constant 0 : i32
    return %arg0, %c0_i32, %c0_i32_0 : i32, i32, i32
  }
  func.func @transform_17(%arg0: i32) -> (i32, i32, i32) {
    %c0_i32 = arith.constant 0 : i32
    %c0_i32_0 = arith.constant 0 : i32
    %c0_i32_1 = arith.constant 0 : i32
    return %arg0, %c0_i32, %c0_i32_0 : i32, i32, i32
  }
  func.func @transform_18(%arg0: i32) -> (i32, i32, i32) {
    %c0_i32 = arith.constant 0 : i32
    %c0_i32_0 = arith.constant 0 : i32
    %c0_i32_1 = arith.constant 0 : i32
    return %arg0, %c0_i32, %c0_i32_0 : i32, i32, i32
  }
  func.func @transform_19(%arg0: i32) -> (i32, i32) {
    %c0_i32 = arith.constant 0 : i32
    %c0_i32_0 = arith.constant 0 : i32
    %c0_i32_1 = arith.constant 0 : i32
    return %c0_i32, %c0_i32_0 : i32, i32
  }
  func.func @transform_20(%arg0: i32) -> (i32, i32) {
    %c0_i32 = arith.constant 0 : i32
    %c0_i32_0 = arith.constant 0 : i32
    %c0_i32_1 = arith.constant 0 : i32
    return %c0_i32, %c0_i32_0 : i32, i32
  }
  func.func @transform_21(%arg0: i32) -> (i32, i32) {
    %c0_i32 = arith.constant 0 : i32
    %c0_i32_0 = arith.constant 0 : i32
    %c0_i32_1 = arith.constant 0 : i32
    return %c0_i32, %c0_i32_0 : i32, i32
  }
  func.func @transform_22(%arg0: i32) -> (i32, i32) {
    %c0_i32 = arith.constant 0 : i32
    %c0_i32_0 = arith.constant 0 : i32
    %c0_i32_1 = arith.constant 0 : i32
    return %c0_i32, %c0_i32_0 : i32, i32
  }
}

</mosaic_0001>

<bundles_post_ra>
// kernel: tpu_custom_call.1
= control target key start
LH: loop header
LB: loop body
LE: loop exit
PB: predicated region body
PF: predicated region fallthrough
CT: control target
= control target key end

     0   :  { %s5256_s0 = inlined_call_operand.vmem [shape: s32[16,1], index: 0, kind: input, shape index: {}]   ;;  %s5257_s1 = inlined_call_operand.vmem [shape: f32[2,8], index: 1, kind: input, shape index: {}]   ;;  %s5258_s2 = inlined_call_operand.vmem [shape: s32[16,1], index: 2, kind: input, shape index: {}]   ;;  %s5259_s3 = inlined_call_operand.hbm [shape: f32[64,128], index: 3, kind: input, shape index: {}]   ;;  %s5260_s4 = inlined_call_operand.vmem [shape: f32[8,128], index: 4, kind: input, shape index: {}]   ;;  %s5261_s5 = inlined_call_operand.vmem [shape: f32[1,128], index: 5, kind: input, shape index: {}]   ;;  %s5262_s6 = inlined_call_operand.vmem [shape: f32[1,128], index: 6, kind: input, shape index: {}]   ;;  %s5263_s7 = inlined_call_operand.hbm [shape: bf16[2,128,384], index: 7, kind: input, shape index: {}]   ;;  %s5264_s8 = inlined_call_operand.vmem [shape: f32[2,1,384], index: 8, kind: input, shape index: {}]   ;;  %s5265_s9 = inlined_call_operand.hbm [shape: bf16[2,128,128], index: 9, kind: input, shape index: {}]   ;;  %s5266_s10 = inlined_call_operand.vmem [shape: f32[2,1,128], index: 10, kind: input, shape index: {}]   ;;  %s5267_s11 = inlined_call_operand.vmem [shape: f32[2,1,128], index: 11, kind: input, shape index: {}]   ;;  %s5268_s12 = inlined_call_operand.vmem [shape: f32[2,1,128], index: 12, kind: input, shape index: {}]   ;;  %s5269_s13 = inlined_call_operand.hbm [shape: bf16[2,128,256], index: 13, kind: input, shape index: {}]   ;;  %s5270_s14 = inlined_call_operand.vmem [shape: f32[2,1,256], index: 14, kind: input, shape index: {}]   ;;  %s5271_s15 = inlined_call_operand.hbm [shape: bf16[2,256,128], index: 15, kind: input, shape index: {}]   ;;  %s5272_s16 = inlined_call_operand.vmem [shape: f32[2,1,128], index: 16, kind: input, shape index: {}]   ;;  %s5273_s17 = inlined_call_operand.vmem [shape: f32[2,1,128], index: 17, kind: input, shape index: {}]   ;;  %s5274_s18 = inlined_call_operand.vmem [shape: f32[2,1,128], index: 18, kind: input, shape index: {}]   ;;  %s5275_s19 = inlined_call_operand.hbm [shape: f32[128,128], index: 19, kind: input, shape index: {}]   ;;  %s5276_s20 = inlined_call_operand.vmem [shape: f32[1,128], index: 20, kind: input, shape index: {}]   ;;  %s5277_s21 = inlined_call_operand.hbm [shape: f32[16,128], index: 21, kind: output, shape index: {0}]   ;;  %s5278_s22 = inlined_call_operand.hbm [shape: f32[1,1], index: 22, kind: output, shape index: {1}]  }
   0x1   :  { %5299 = sst [smem:[#allocation26_spill]] %s5256_s0 }
   0x2   :  { %5300 = sst [smem:[#allocation27_spill]] %s5257_s1 }
   0x3   :  { %5301 = sst [smem:[#allocation28_spill]] %s5258_s2 }
   0x4   :  { %5302 = sst [smem:[#allocation29_spill]] %s5259_s3 }
   0x5   :  { %5303 = sst [smem:[#allocation30_spill]] %s5260_s4 }
   0x6   :  { %5304 = sst [smem:[#allocation31_spill]] %s5261_s5 }
   0x7   :  { %5305 = sst [smem:[#allocation32_spill]] %s5262_s6 }
   0x8   :  { %5306 = sst [smem:[#allocation33_spill]] %s5263_s7 }
   0x9   :  { %5307 = sst [smem:[#allocation34_spill]] %s5264_s8 }
   0xa   :  { %5308 = sst [smem:[#allocation35_spill]] %s5265_s9 }
   0xb   :  { %5309 = sst [smem:[#allocation36_spill]] %s5267_s11 }
   0xc   :  { %5310 = sst [smem:[#allocation37_spill]] %s5268_s12 }
   0xd   :  { %5311 = sst [smem:[#allocation38_spill]] %s5269_s13 }
   0xe   :  { %5312 = sst [smem:[#allocation39_spill]] %s5270_s14 }
   0xf   :  { %5313 = sst [smem:[#allocation40_spill]] %s5272_s16 }
  0x10   :  { %5314 = sst [smem:[#allocation41_spill]] %s5273_s17 }
  0x11   :  { %5315 = sst [smem:[#allocation42_spill]] %s5274_s18 }
  0x12   :  { %5316 = sst [smem:[#allocation43_spill]] %s5276_s20 }
  0x13   :  { %5317 = sst [smem:[#allocation44_spill]] %s5277_s21 }
  0x14   :  { %5318 = sst [smem:[#allocation45_spill]] %s5278_s22 }
  0x15   :  { %28 = vsyncpa [#allocation4], 0 }
  0x16   :  { %29 = vsyncpa [#allocation7], 0 }
  0x17   :  { %31 = vsyncpa [#allocation7 + $0x1], 0 }
  0x18   :  { %32 = vsyncpa [#allocation10], 0 }
  0x19   :  { %34 = vsyncpa [#allocation10 + $0x1], 0 }
  0x1a   :  { %35 = vsyncpa [#allocation13], 0 }
  0x1b   :  { %36 = vsyncpa [#allocation5], 0 }
  0x1c   :  { %37 = vsyncpa [#allocation16], 0  ;;  %s4484_s3 = smov 0   ;;  %s4486_s28 = smov 0  }
  0x1d   :  { %s4488_s29 = smov 0   ;;  %s4490_s30 = smov 0  }
  0x1e LB: > { %5319 = sst [smem:[#allocation23_spill]] %s4336_s29  ;;  %s4505_s4 = sadd.s32 1, %s4340_s30   ;;  %s4340_s30 = sphi %s4490_s30, %s5369_s30   ;;  %s4336_s29 = sphi %s4488_s29, %s5371_s29   ;;  %s4332_s28 = sphi %s4486_s28, %s5373_s28   ;;  %s4328_s3 = sphi %s4484_s3, %s5372_s3  }
  0x1f   : > { %5320 = sst [smem:[#allocation24_spill]] %s4505_s4  ;;  %s197_s0 = sadd.s32 1, %s4336_s29 }
  0x20   : > { %s194_s23 = ssub.s32 %s4340_s30, %s4505_s4  ;;  %p204_p0 = scmp.ne.s32.totalorder %s4336_s29, %s4332_s28 }
  0x21   : > { %p195_p1 = scmp.eq.s32.totalorder %s194_s23, 0  ;;  %p205_p2 = scmp.eq.s32.totalorder %s4340_s30, 0 }
  0x22   : > { %p3836_p3 = scmp.lt.s32.totalorder %s4340_s30, 2  ;;  %s4519_s24 = sand.u32 1, %s4336_s29  }
  0x23   : > { %s4515_s1 = scalar_select %p195_p1, %s4336_s29, %s197_s0  }
  0x24   : > { %p206_p4 = por %p205_p2, %p204_p0  ;;  %s3786_s6 = smul.u32 192, %s4519_s24 }
  0x25   : > { %5321 = sst [smem:[#allocation25_spill]] %s4515_s1  ;;  %s3787_s26 = smul.u32 3072, %s4340_s30 }
  0x26   : > { %p4522_p5 = pnand %p3836_p3, %p206_p4  ;;  %s5323_s7 = sld [smem:[#allocation33_spill]] }
  0x27   : > { %s655_s0 = scalar_lea.vmem [#allocation6], %s3786_s6  ;;  %s5324_s1 = sand.u32 1, %s4340_s30  }
  0x28   : > { %s5322_s25 = scalar_select %p4522_p5, 1, 0 }
  0x29   : > { %s662_s5 = sshll.u32 %s655_s0, 4  ;;  %s4536_s29 = scalar_lea.sflag [#allocation7], %s5324_s1  ;;  %s4532_s5 = int_to_ptr.vmem [resolvable:$true] %s662_s5 }
  0x2a   : > { %p4542_p7 = pneg %p4522_p5 }
  0x2c   : > { %s4530_s23 = scalar_lea.hbm %s5323_s7, %s3787_s26  ;;  %s4063_s6 = scalar_lea.hbm %s5323_s7, 6144 }
  0x2d   : > { %s4058_s4 = scalar_lea.hbm %s4530_s23, 3072  ;;  %p4064_p10 = scmp.lt.u32.totalorder %s4530_s23, %s5323_s7 }
  0x2e   : > { %p4059_p6 = scmp.ne.s32.totalorder %s4530_s23, %s4058_s4  ;;  %p4065_p11 = scmp.lt.u32.totalorder %s4063_s6, %s4058_s4 }
  0x2f   : > { %s5325_s22 = scalar_select %p4542_p7, 1, 0 }
  0x30   : > { %p4061_p8 = pnand %p4542_p7, %p4059_p6  ;;  %p4066_p12 = por %p4065_p11, %p4064_p10 }
  0x31   : > { %p4067_p13 = scmp.lt.u32.totalorder %s4058_s4, %s4530_s23 }
  0x32   : > { %p4062_p9 = pneg %p4061_p8 }
  0x33   : > { %p4068_p0 = por %p4067_p13, %p4066_p12 }
  0x35   : > { %p4069_p1 = pnand %p4068_p0, %p4062_p9 }
  0x37   : > { %4072 = shalt.err (!%p4069_p1)
}
  0x38   : > { %s4073_s1 = scalar_lea.vmem %s4532_s5, 3072  ;;  %s4342_s26 = smov [#allocation6]  }
  0x39   : > { %p4074_p2 = scmp.ne.s32.totalorder %s4532_s5, %s4073_s1  ;;  %s4078_s2 = sshll.u32 %s4342_s26, 4  ;;  %s4079_s2 = int_to_ptr.vmem [resolvable:$false] %s4078_s2 }
  0x3a   : > { %s4080_s27 = scalar_lea.vmem %s4079_s2, 6144  ;;  %p4081_p6 = scmp.lt.s32.totalorder %s4532_s5, %s4079_s2 }
  0x3b   : > { %p4076_p3 = pnand %p4074_p2, %p4542_p7  ;;  %p4082_p8 = scmp.lt.s32.totalorder %s4080_s27, %s4073_s1 }
  0x3d   : > { %p4077_p4 = pneg %p4076_p3  ;;  %p4083_p10 = por %p4082_p8, %p4081_p6 }
  0x3f   : > { %p4084_p11 = pnand %p4083_p10, %p4077_p4 }
  0x41   : > { %4087 = shalt.err (!%p4084_p11)
}
  0x42   : > { %s4343_s4 = smov 192   ;;  %s4344_s6 = smov 12  }
  0x43   : > { %3824 = dma.hbm_to_vmem [thread:$0]  (!%p4522_p5), %s4530_s23, 3072, %s4532_s5, %s4536_s29, %s4343_s4, %s4343_s4, %s4344_s6  }
  0x44   : > { %s3326_s0 = sshll.u32 %s4519_s24, 7  ;;  %s3446_s26 = sshll.u32 %s4340_s30, 11 }
  0x45   : > { %s5326_s13 = sld [smem:[#allocation38_spill]]  ;;  %s722_s7 = scalar_lea.vmem [#allocation9], %s3326_s0 }
  0x46   : > { %s729_s21 = sshll.u32 %s722_s7, 4  ;;  %s5327_s20 = sand.u32 1, %s4340_s30   ;;  %s4577_s21 = int_to_ptr.vmem [resolvable:$true] %s729_s21 }
  0x47   : > { %s4581_s18 = scalar_lea.sflag [#allocation10], %s5327_s20 }
  0x4b   : > { %s4573_s27 = scalar_lea.hbm %s5326_s13, %s3446_s26  ;;  %s4093_s6 = scalar_lea.hbm %s5326_s13, 4096 }
  0x4c   : > { %s4088_s5 = scalar_lea.hbm %s4573_s27, 2048  ;;  %p4094_p0 = scmp.lt.u32.totalorder %s4573_s27, %s5326_s13 }
  0x4d   : > { %p4089_p9 = scmp.ne.s32.totalorder %s4573_s27, %s4088_s5  ;;  %p4095_p1 = scmp.lt.u32.totalorder %s4093_s6, %s4088_s5 }
  0x4e   : > { %p4097_p3 = scmp.lt.u32.totalorder %s4088_s5, %s4573_s27 }
  0x4f   : > { %p4091_p12 = pnand %p4089_p9, %p4542_p7  ;;  %p4096_p2 = por %p4095_p1, %p4094_p0 }
  0x51   : > { %p4092_p13 = pneg %p4091_p12  ;;  %p4098_p4 = por %p4097_p3, %p4096_p2 }
  0x53   : > { %p4099_p6 = pnand %p4098_p4, %p4092_p13 }
  0x55   : > { %4102 = shalt.err (!%p4099_p6)
}
  0x56   : > { %s4103_s7 = scalar_lea.vmem %s4577_s21, 2048  ;;  %s4345_s20 = smov [#allocation9]  }
  0x57   : > { %p4104_p8 = scmp.ne.s32.totalorder %s4577_s21, %s4103_s7  ;;  %s4108_s23 = sshll.u32 %s4345_s20, 4  ;;  %s4109_s23 = int_to_ptr.vmem [resolvable:$false] %s4108_s23 }
  0x58   : > { %s4110_s4 = scalar_lea.vmem %s4109_s23, 4096  ;;  %p4111_p9 = scmp.lt.s32.totalorder %s4577_s21, %s4109_s23 }
  0x59   : > { %p4106_p10 = pnand %p4104_p8, %p4542_p7  ;;  %p4112_p12 = scmp.lt.s32.totalorder %s4110_s4, %s4103_s7 }
  0x5b   : > { %p4107_p11 = pneg %p4106_p10  ;;  %p4113_p0 = por %p4112_p12, %p4111_p9 }
  0x5d   : > { %p4114_p1 = pnand %p4113_p0, %p4107_p11 }
  0x5f   : > { %4117 = shalt.err (!%p4114_p1)
}
  0x60   : > { %s5287_s5 = smov 128   ;;  %s5289_s6 = smov 8  }
  0x61   : > { %3830 = dma.hbm_to_vmem [thread:$0]  (!%p4522_p5), %s4573_s27, 2048, %s4577_s21, %s4581_s18, %s5287_s5, %s5287_s5, %s5289_s6  }
  0x62   : > { %s4613_s7 = scalar_lea.hbm %s5271_s15, %s3446_s26  ;;  %s750_s20 = scalar_lea.vmem [#allocation11], %s3326_s0 }
  0x63   : > { %s757_s23 = sshll.u32 %s750_s20, 4  ;;  %s4620_s4 = sadd.s32 4294967295, %s4340_s30   ;;  %s4617_s23 = int_to_ptr.vmem [resolvable:$true] %s757_s23 }
  0x64   : > { %p210_p13 = scmp.ne.s32.totalorder %s4332_s28, %s4328_s3  ;;  %p5291_p2 = scmp.eq.s32.totalorder %s4620_s4, 0 }
  0x65   : > { %p3318_p3 = scmp.ge.s32.totalorder %s4340_s30, 1  ;;  %p591_p4 = scmp.lt.s32.totalorder %s4340_s30, 3 }
  0x66   : > { %p4629_p6 = por %p5291_p2, %p210_p13  ;;  %s4348_s26 = smov [#allocation3]  }
  0x67   : > { %p4634_p10 = pnand %p3318_p3, %p591_p4  ;;  %s612_s27 = sshll.u32 %s4348_s26, 4  ;;  %s613_s27 = int_to_ptr.vmem [resolvable:$true] %s612_s27 }
  0x68   : > { %s5328_s21 = scalar_select %p4629_p6, 1, 0 }
  0x69   : > { %s5329_s0 = scalar_select %p4634_p10, 1, 0 }
  0x6a   : > { %p3814_p11 = pneg %p4634_p10  ;;  %s4349_s3 = smov [#allocation12]  }
  0x6b   : > { %s634_s1 = sshll.u32 %s4349_s3, 4  ;;  %s3445_s5 = sshll.u32 %s4340_s30, 10  ;;  %s4647_s1 = int_to_ptr.vmem [resolvable:$true] %s634_s1 }
  0x6c   : > { %p4643_p9 = pnand %p3814_p11, %p5291_p2  ;;  %s5331_s9 = sld [smem:[#allocation35_spill]] }
  0x6d   : > { %s5332_s14 = sld [smem:[#allocation29_spill]] }
  0x6e   : > { %p4120_p0 = pneg %p4643_p9 }
  0x72   : > { %s4653_s26 = scalar_lea.hbm %s5331_s9, %s3445_s5 }
  0x73   : > { %s4118_s3 = scalar_lea.hbm %s5332_s14, 1024 }
  0x74   : > { %p4119_p12 = scmp.ne.s32.totalorder %s5332_s14, %s4118_s3  ;;  %p4125_p3 = scmp.lt.u32.totalorder %s4118_s3, %s5332_s14 }
  0x76   : > { %p4121_p1 = pnand %p4120_p0, %p4119_p12 }
  0x78   : > { %p4122_p13 = pneg %p4121_p1 }
  0x7a   : > { %p4127_p4 = pnand %p4125_p3, %p4122_p13 }
  0x7c   : > { %4130 = shalt.err (!%p4127_p4)
}
  0x7d   : > { %s4131_s13 = scalar_lea.vmem %s613_s27, 1024  ;;  %p4139_p6 = scmp.lt.s32.totalorder %s613_s27, %s613_s27 }
  0x7e   : > { %p4132_p11 = scmp.ne.s32.totalorder %s613_s27, %s4131_s13  ;;  %p4140_p10 = scmp.lt.s32.totalorder %s4131_s13, %s4131_s13 }
  0x80   : > { %p4134_p8 = pnand %p4132_p11, %p4120_p0  ;;  %p4141_p5 = por %p4140_p10, %p4139_p6 }
  0x82   : > { %p4135_p2 = pneg %p4134_p8 }
  0x84   : > { %p4142_p7 = pnand %p4141_p5, %p4135_p2 }
  0x86   : > { %4145 = shalt.err (!%p4142_p7)
}
  0x87   : > { %s5333_s8 = smov 8   ;;  %s5334_s16 = smov 128  }
  0x88   : > { %3817 = dma.hbm_to_vmem [thread:$0]  (!%p4643_p9), %s5332_s14, 1024, %s613_s27, [#allocation4], %s5334_s16, %s5334_s16, %s5333_s8  }
  0x89   : > { %s4146_s2 = scalar_lea.hbm %s5275_s19, 2048 }
  0x8a   : > { %p4147_p6 = scmp.ne.s32.totalorder %s5275_s19, %s4146_s2  ;;  %p4153_p2 = scmp.lt.u32.totalorder %s4146_s2, %s5275_s19 }
  0x8c   : > { %p4149_p5 = pnand %p4147_p6, %p4120_p0 }
  0x8e   : > { %p4150_p7 = pneg %p4149_p5 }
  0x90   : > { %p4155_p8 = pnand %p4153_p2, %p4150_p7 }
  0x92   : > { %4158 = shalt.err (!%p4155_p8)
}
  0x93   : > { %s4159_s27 = scalar_lea.vmem %s4647_s1, 2048  ;;  %p4167_p13 = scmp.lt.s32.totalorder %s4647_s1, %s4647_s1 }
  0x94   : > { %p4160_p10 = scmp.ne.s32.totalorder %s4647_s1, %s4159_s27  ;;  %p4168_p3 = scmp.lt.s32.totalorder %s4159_s27, %s4159_s27 }
  0x96   : > { %p4162_p12 = pnand %p4160_p10, %p4120_p0  ;;  %p4169_p4 = por %p4168_p3, %p4167_p13 }
  0x98   : > { %p4163_p1 = pneg %p4162_p12 }
  0x9a   : > { %p4170_p11 = pnand %p4169_p4, %p4163_p1 }
  0x9c   : > { %4173 = shalt.err (!%p4170_p11)
}
  0x9d   : > { %3820 = dma.hbm_to_vmem [thread:$0]  (!%p4643_p9), %s5275_s19, 2048, %s4647_s1, [#allocation13], %s5334_s16, %s5334_s16, %s5333_s8  }
  0x9e   : > { %s5335_s17 = sshll.u32 %s4519_s24, 6  ;;  %s4174_s20 = scalar_lea.hbm %s4653_s26, 1024 }
  0x9f   : > { %s683_s5 = scalar_lea.vmem [#allocation8], %s5335_s17  ;;  %p4175_p0 = scmp.ne.s32.totalorder %s4653_s26, %s4174_s20 }
  0xa0   : > { %s690_s6 = sshll.u32 %s683_s5, 4  ;;  %p5336_p6 = scmp.ne.s32.totalorder %s5325_s22, 0  ;;  %s4710_s6 = int_to_ptr.vmem [resolvable:$true] %s690_s6 }
  0xa1   : > { %s4179_s30 = scalar_lea.hbm %s5331_s9, 2048  ;;  %p4180_p2 = scmp.lt.u32.totalorder %s4653_s26, %s5331_s9 }
  0xa2   : > { %p4177_p5 = pnand %p4175_p0, %p5336_p6  ;;  %p4181_p8 = scmp.lt.u32.totalorder %s4179_s30, %s4174_s20 }
  0xa3   : > { %p4183_p10 = scmp.lt.u32.totalorder %s4174_s20, %s4653_s26 }
  0xa4   : > { %p4178_p7 = pneg %p4177_p5  ;;  %p4182_p9 = por %p4181_p8, %p4180_p2 }
  0xa6   : > { %p4184_p12 = por %p4183_p10, %p4182_p9 }
  0xa8   : > { %p4185_p1 = pnand %p4184_p12, %p4178_p7 }
  0xaa   : > { %4188 = shalt.err (!%p4185_p1)
}
  0xab   : > { %s4189_s24 = scalar_lea.vmem %s4710_s6, 1024  ;;  %s4350_s1 = smov [#allocation8]  }
  0xac   : > { %p4190_p13 = scmp.ne.s32.totalorder %s4710_s6, %s4189_s24  ;;  %s4194_s8 = sshll.u32 %s4350_s1, 4  ;;  %s4195_s8 = int_to_ptr.vmem [resolvable:$false] %s4194_s8 }
  0xad   : > { %s4196_s16 = scalar_lea.vmem %s4195_s8, 2048  ;;  %p4197_p11 = scmp.lt.s32.totalorder %s4710_s6, %s4195_s8 }
  0xae   : > { %p4192_p3 = pnand %p4190_p13, %p5336_p6  ;;  %p4198_p0 = scmp.lt.s32.totalorder %s4196_s16, %s4189_s24 }
  0xb0   : > { %p4193_p4 = pneg %p4192_p3  ;;  %p4199_p5 = por %p4198_p0, %p4197_p11 }
  0xb2   : > { %p4200_p2 = pnand %p4199_p5, %p4193_p4 }
  0xb4   : > { %4203 = shalt.err (!%p4200_p2)
}
  0xb5   : > { %s4351_s11 = smov 64   ;;  %s4352_s12 = smov 4  }
  0xb6   : > { %p5337_p7 = scmp.ne.s32.totalorder %s5322_s25, 0  ;;  %s4204_s17 = scalar_lea.hbm %s4613_s7, 2048 }
  0xb7   : > { %p4205_p8 = scmp.ne.s32.totalorder %s4613_s7, %s4204_s17  ;;  %s4209_s2 = scalar_lea.hbm %s5271_s15, 4096 }
  0xb8   : > { %3827 = dma.hbm_to_vmem [thread:$0]  (!%p5337_p7), %s4653_s26, 1024, %s4710_s6, %s4536_s29, %s4351_s11, %s4351_s11, %s4352_s12  }
  0xb9   : > { %p4207_p9 = pnand %p4205_p8, %p5336_p6  ;;  %p4210_p12 = scmp.lt.u32.totalorder %s4613_s7, %s5271_s15 }
  0xba   : > { %p4211_p1 = scmp.lt.u32.totalorder %s4209_s2, %s4204_s17  ;;  %p4213_p3 = scmp.lt.u32.totalorder %s4204_s17, %s4613_s7 }
  0xbb   : > { %p4208_p10 = pneg %p4207_p9 }
  0xbc   : > { %p4212_p13 = por %p4211_p1, %p4210_p12 }
  0xbe   : > { %p4214_p4 = por %p4213_p3, %p4212_p13 }
  0xc0   : > { %p4215_p11 = pnand %p4214_p4, %p4208_p10 }
  0xc2   : > { %4218 = shalt.err (!%p4215_p11)
}
  0xc3   : > { %s4219_s29 = scalar_lea.vmem %s4617_s23, 2048  ;;  %s4353_s26 = smov [#allocation11]  }
  0xc4   : > { %p4220_p0 = scmp.ne.s32.totalorder %s4617_s23, %s4219_s29  ;;  %s4224_s6 = sshll.u32 %s4353_s26, 4  ;;  %s4225_s6 = int_to_ptr.vmem [resolvable:$false] %s4224_s6 }
  0xc5   : > { %s4226_s13 = scalar_lea.vmem %s4225_s6, 4096  ;;  %p4227_p8 = scmp.lt.s32.totalorder %s4617_s23, %s4225_s6 }
  0xc6   : > { %p4222_p5 = pnand %p4220_p0, %p5336_p6  ;;  %p4228_p9 = scmp.lt.s32.totalorder %s4226_s13, %s4219_s29 }
  0xc8   : > { %p4223_p2 = pneg %p4222_p5  ;;  %p4229_p12 = por %p4228_p9, %p4227_p8 }
  0xca   : > { %p4230_p1 = pnand %p4229_p12, %p4223_p2 }
  0xcc   : > { %4233 = shalt.err (!%p4230_p1)
}
  0xcd   : > { %3833 = dma.hbm_to_vmem [thread:$0]  (!%p5337_p7), %s4613_s7, 2048, %s4617_s23, %s4581_s18, %s4351_s11, %s4351_s11, %s4352_s12  }
  0xce   : > { %p5338_p6 = scmp.ne.s32.totalorder %s5329_s0, 0 }
  0xcf   : > { %p5339_p10 = scmp.eq.s32.totalorder (!%p5338_p6), %s4620_s4, 0 }
  0xd0   : > { %787 = sbr.rel (%p5338_p6) target bundleno = 5781 (0x1695), region = 104 }
  0xd7   : > { %4303 = dma.done.wait (%p5339_p10), [#allocation4], 1024   ;;  %p5340_p13 = pmov %p5339_p10 }
  0xd8   : > { %s793_s22 = sand.u32 1, %s4620_s4   ;;  %s795_s25 = sand.u32 1, %s4332_s28  }
  0xd9   : > { %4305 = vsyncadd (%p5340_p13), [#allocation4], 4294966272  ;;  %s3788_s27 = smul.u32 192, %s795_s25  ;;  %s794_s24 = scalar_lea.sflag [#allocation7], %s793_s22 }
  0xda   : > { %p5341_p3 = scmp.ne.s32.totalorder %s5328_s21, 0 }
  0xdb   : > { %s4770_s1 = scalar_lea.vmem [#allocation6], %s3788_s27 }
  0xdc   : > { %4307 = dma.done.wait (%p5341_p3), %s794_s24, 4096  }
  0xdd   : > { %4309 = vsyncadd (%p5341_p3), %s794_s24, 4294963200  ;;  %s3334_s18 = sshll.u32 %s795_s25, 6  ;;  %s3335_s7 = sshll.u32 %s795_s25, 7 }
  0xde   : > { %s4776_s23 = scalar_lea.vmem [#allocation8], %s3334_s18  ;;  %s812_s0 = scalar_lea.sflag [#allocation10], %s793_s22 }
  0xdf   : > { %s4778_s8 = scalar_lea.vmem [#allocation9], %s3335_s7 }
  0xe0   : > { %4311 = dma.done.wait (%p5341_p3), %s812_s0, 4096  }
  0xe1   : > { %4313 = vsyncadd (%p5341_p3), %s812_s0, 4294963200  ;;  %s4784_s16 = scalar_lea.vmem [#allocation11], %s3335_s7  ;;  %p5342_p7 = pmov %p5339_p10 }
  0xe3   : > { %4315 = dma.done.wait (%p5342_p7), [#allocation13], 2048   ;;  %p5343_p4 = pmov %p5342_p7 }
  0xe4   : > { %p925_p11 = scmp.lt.s32.totalorder %s4620_s4, 1  ;;  %s5346_s27 = sld [smem:[#allocation34_spill]] }
  0xe5   : > { %4317 = vsyncadd (%p5343_p4), [#allocation13], 4294965248  ;;  %s5347_s9 = sld [smem:[#allocation39_spill]]  ;;  %s5348_s5 = sld [smem:[#allocation40_spill]] }
  0xe6   : > { %s4792_s11 = scalar_select %p925_p11, %s4620_s4, 1 }
  0xe7   : > { %s5349_s30 = sld [smem:[#allocation41_spill]]  ;;  %s5350_s13 = sld [smem:[#allocation42_spill]] }
  0xe8   : > { %s3789_s21 = smul.u32 3, %s4792_s11  ;;  %s3338_s18 = sshll.u32 %s4792_s11, 1 }
  0xe9   : > { %p5351_p0 = scmp.ne.s32.totalorder %s4620_s4, 0 }
  0xea   : > { %s4810_s24 = scalar_lea.vmem %s5346_s27, %s3789_s21  ;;  %s5352_s27 = sld [smem:[#allocation26_spill]] (!%p5351_p0)  ;;  %v972_v1 = vld [vmem:[#allocation3] sm:$0xff] (!%p5351_p0)  ;;  %v4354_v2 = vmov (!%p5351_p0), 0   ;;  %v973_v3 = vld [vmem:[#allocation3 + $0x8] sm:$0xff] (!%p5351_p0)  ;;  %v974_v4 = vld [vmem:[#allocation3 + $0x10] sm:$0xff] (!%p5351_p0)  ;;  %v958_v15 = vlaneseq (!%p5351_p0)  ;;  %vm980_vm0 = vcmask (!%p5351_p0), 523264  }
  0xeb   : > { %s4816_s14 = scalar_lea.vmem %s5347_s9, %s3338_s18  ;;  %s944_s20 = scalar_lea.vmem %s5348_s5, %s4792_s11  ;;  %3898 = vset.pattern.permute.xlu0 (!%p5351_p0), %v4354_v2  ;;  %v975_v5 = vld [vmem:[#allocation3 + $0x18] sm:$0xff] (!%p5351_p0)  ;;  %v3738_v6 = vpack.c.bf16 (!%p5351_p0), %v973_v3, %v972_v1  ;;  %v976_v9 = vld [vmem:[#allocation3 + $0x20] sm:$0xff] (!%p5351_p0)  ;;  %v977_v10 = vld [vmem:[#allocation3 + $0x28] sm:$0xff] (!%p5351_p0)  ;;  %v4355_v18 = vmov (!%p5351_p0), 0.0  }
  0xec   : > { %955 = sbr.rel (%p5351_p0) target bundleno = 906 (0x38a), region = 132  ;;  %v3742_v7 = vpack.c.bf16 (!%p5351_p0), %v975_v5, %v974_v4  ;;  %v3746_v11 = vpack.c.bf16 (!%p5351_p0), %v977_v10, %v976_v9  ;;  %v978_v12 = vld [vmem:[#allocation3 + $0x30] sm:$0xff] (!%p5351_p0)  ;;  %v979_v13 = vld [vmem:[#allocation3 + $0x38] sm:$0xff] (!%p5351_p0)  ;;  %v959_v16 = vand.u32 (!%p5351_p0), 127, %v958_v15  ;;  %s5353_s18 = sld [smem:[#allocation30_spill]] (!%p5351_p0) }
  0xed   : > { %s947_s29 = scalar_lea.vmem %s5349_s30, %s4792_s11  ;;  %s950_s22 = scalar_lea.vmem %s5350_s13, %s4792_s11  ;;  %3739 = vmatprep.subr.bf16.mxu0 (!%p5351_p0), %v3738_v6  ;;  %v3750_v14 = vpack.c.bf16 (!%p5351_p0), %v979_v13, %v978_v12 }
  0xee   : > { %3741 = vmatpush3.bf16.msra.mxu0 (!%p5351_p0), %v3738_v6  ;;  %s5354_s12 = sld [smem:[#allocation31_spill]] (!%p5351_p0)  ;;  %s5355_s3 = sld [smem:[#allocation32_spill]] (!%p5351_p0) }
  0xef   : > { %3743 = vmatprep.subr.bf16.mxu0 (!%p5351_p0), %v3742_v7 }
  0xf0   : > { %v956_v0 = vld [vmem:[%s5352_s27] sm:$0xff] (!%p5351_p0)  ;;  %v957_v8 = vld [vmem:[%s5352_s27 + $0x8] sm:$0xff] (!%p5351_p0) }
  0xf1   : > { %961 = vperm.xlu0 (!%p5351_p0), %3898, %v956_v0  }
  0xf2   : > { %3745 = vmatpush3.bf16.msra.mxu0 (!%p5351_p0), %v3742_v7  ;;  %v1062_v22 = vld [vmem:[%s5353_s18] sm:$0xff] (!%p5351_p0) }
  0xf3   : > { %3747 = vmatprep.subr.bf16.mxu0 %v3746_v11 }
  0xf4   : > { %v3344_v42 = vld [vmem:[%s5354_s12] ss:$0 sm:$0xff] }
  0xf5   : > { %964 = vperm.xlu0 %3898, %v957_v8   ;;  %v3345_v44 = vld [vmem:[%s5355_s3] ss:$0 sm:$0xff] }
  0xf6   : > { %3749 = vmatpush3.bf16.msra.mxu0 %v3746_v11 }
  0xf7   : > { %3751 = vmatprep.subr.bf16.mxu0 %v3750_v14 }
  0xfa   : > { %3753 = vmatpush3.bf16.msra.mxu0 %v3750_v14 }
 0x170   : > { %v962_v17 = vpop.permute.xlu0 %961 }
 0x171   : > { %vm966_vm1 = vcmp.eq.s32.totalorder %v959_v16, %v962_v17 }
 0x172   : > { %v3340_v19 = vsel %vm966_vm1, 1.0, %v4355_v18 }
 0x173   : > { %3564 = vmatprep.mubr.msk.f32.mxu0 %vm980_vm0, %v3340_v19 }
 0x174   : > { %v965_v20 = vpop.permute.xlu0 %964 }
 0x175   : > { %vm967_vm2 = vcmp.eq.s32.totalorder %v959_v16, %v965_v20 }
 0x176   : > { %v3341_v21 = vsel %vm967_vm2, 1.0, %v4355_v18 }
 0x177   : > { %3565 = vmatmul.mubr.msk.f32.vlgmr.msra.gmra.mrb[0].mxu0 %vm980_vm0, %v3341_v21 }
 0x24a   : > { %v3566_v23 = vpop.f32.mrb[0].mxu0 }
 0x24b   : > { %v1053_v24 = vpop.f32.mrb[1].mxu0  ;;  %v1064_v26 = vadd.f32 %v3566_v23, %v1062_v22 }
 0x24c   : > { %v1063_v25 = vadd.f32 %v1062_v22, %v1053_v24 }
 0x24e   : > { %1067 = vadd.xlane.f32.xlu1 %v1063_v25 }
 0x252   : > { %1069 = vadd.xlane.f32.xlu1 %v1064_v26 }
 0x2db   : > { %v1068_v27 = vpop.xlane.xlu1 %1067 }
 0x2dc   : > { %v1072_v28 = vmul.f32 0.0078125, %v1068_v27 }
 0x2de   : > { %v1074_v29 = vsub.f32 %v1063_v25, %v1072_v28 }
 0x2df   : > { %v1070_v30 = vpop.xlane.xlu1 %1069 }
 0x2e0   : > { %v1073_v31 = vmul.f32 0.0078125, %v1070_v30  ;;  %v1076_v32 = vmul.f32 %v1074_v29, %v1074_v29 }
 0x2e2   : > { %v1075_v33 = vsub.f32 %v1064_v26, %v1073_v31  ;;  %1078 = vadd.xlane.f32.xlu0 %v1076_v32 }
 0x2e4   : > { %v1077_v34 = vmul.f32 %v1075_v33, %v1075_v33 }
 0x2e6   : > { %1080 = vadd.xlane.f32.xlu1 %v1077_v34 }
 0x36f   : > { %v1079_v35 = vpop.xlane.xlu0 %1078 }
 0x370   : > { %v1082_v36 = vmul.f32 0.0078125, %v1079_v35 }
 0x372   : > { %v1084_v37 = vadd.f32 1e-12, %v1082_v36 }
 0x373   : > { %v1081_v38 = vpop.xlane.xlu1 %1080 }
 0x374   : > { %3899 = vrsqrt.f32 %v1084_v37  ;;  %v1083_v39 = vmul.f32 0.0078125, %v1081_v38 }
 0x376   : > { %v1085_v40 = vadd.f32 1e-12, %v1083_v39 }
 0x378   : > { %3901 = vrsqrt.f32 %v1085_v40 }
 0x37e   : > { %v3900_v41 = vpop.eup %3899 }
 0x37f   : > { %v1088_v43 = vmul.f32 %v3900_v41, %v1074_v29 }
 0x381   : > { %v1096_v45 = vmul.f32 %v3344_v42, %v1088_v43 }
 0x382   : > { %v3902_v46 = vpop.eup %3901 }
 0x383   : > { %v1104_v47 = vadd.f32 %v3345_v44, %v1096_v45  ;;  %v1089_v48 = vmul.f32 %v3902_v46, %v1075_v33 }
 0x385   : > { %1106 = vst [vmem:[#allocation2] sm:$0xff] %v1104_v47  ;;  %v1097_v49 = vmul.f32 %v3344_v42, %v1089_v48 }
 0x387   : > { %v1105_v50 = vadd.f32 %v3345_v44, %v1097_v49 }
 0x389   : > { %1107 = vst [vmem:[#allocation2 + $0x8] sm:$0xff] %v1105_v50 }
 0x38a PF: > { %v3918_v51 = vld [vmem:[%s4770_s1 + $0x4] ss:$12 sps:$4 sm:$0xff]   ;;  %v3920_v52 = vld [vmem:[%s4770_s1] ss:$12 sps:$4 sm:$0xff]   ;;  %v4356_v53 = vmov 0   ;;  %v4357_v54 = vmov 0.0   ;;  %v1145_v16 = vlaneseq  ;;  %s5357_s5 = scalar_lea.vmem %s5266_s10, %s4792_s11 }
 0x38b   : > { %1320 = vmatprep.mubr.bf16.mxu0 %v4356_v53  ;;  %3567 = vmatprep.subr.bf16.mxu1 %v4357_v54  ;;  %v3921_v55 = vld [vmem:[%s4770_s1 + $0x1c] ss:$12 sps:$4 sm:$0xff]   ;;  %v3923_v56 = vld [vmem:[%s4770_s1 + $0x18] ss:$12 sps:$4 sm:$0xff]   ;;  %v3924_v57 = vld [vmem:[%s4770_s1 + $0x34] ss:$12 sps:$4 sm:$0xff]  }
 0x38c   : > { %1288 = vmatprep.subr.bf16.mxu0 %v3918_v51  ;;  %v3926_v58 = vld [vmem:[%s4770_s1 + $0x30] ss:$12 sps:$4 sm:$0xff]   ;;  %v3927_v59 = vld [vmem:[%s4770_s1 + $0x4c] ss:$12 sps:$4 sm:$0xff]   ;;  %v3929_v60 = vld [vmem:[%s4770_s1 + $0x48] ss:$12 sps:$4 sm:$0xff]  }
 0x38d   : > { %1289 = vmatpush1.bf16.msra.mxu0 %v3920_v52  ;;  %v3930_v61 = vld [vmem:[%s4770_s1 + $0x64] ss:$12 sps:$4 sm:$0xff]   ;;  %v3942_v62 = vld [vmem:[%s4770_s1 + $0x8] ss:$12 sps:$4 sm:$0xff]   ;;  %v3943_v63 = vld [vmem:[%s4770_s1 + $0x20] ss:$12 sps:$4 sm:$0xff]  }
 0x38e   : > { %1290 = vmatprep.subr.bf16.mxu0 %v3921_v55  ;;  %3568 = vmatpush3.bf16.msra.mxu1 %v3942_v62  ;;  %v3932_v0 = vld [vmem:[%s4770_s1 + $0x60] ss:$12 sps:$4 sm:$0xff]   ;;  %v3933_v1 = vld [vmem:[%s4770_s1 + $0x7c] ss:$12 sps:$4 sm:$0xff]   ;;  %v3944_v2 = vld [vmem:[%s4770_s1 + $0x38] ss:$12 sps:$4 sm:$0xff]  }
 0x38f   : > { %3569 = vmatprep.subr.bf16.mxu1 %v4357_v54  ;;  %v3935_v3 = vld [vmem:[%s4770_s1 + $0x78] ss:$12 sps:$4 sm:$0xff]   ;;  %v3936_v4 = vld [vmem:[%s4770_s1 + $0x94] ss:$12 sps:$4 sm:$0xff]   ;;  %v3945_v5 = vld [vmem:[%s4770_s1 + $0x50] ss:$12 sps:$4 sm:$0xff]  }
 0x390   : > { %v3938_v6 = vld [vmem:[%s4770_s1 + $0x90] ss:$12 sps:$4 sm:$0xff]   ;;  %v3939_v7 = vld [vmem:[%s4770_s1 + $0xac] ss:$12 sps:$4 sm:$0xff]   ;;  %v3946_v8 = vld [vmem:[%s4770_s1 + $0x68] ss:$12 sps:$4 sm:$0xff]  }
 0x391   : > { %1291 = vmatpush1.bf16.msra.mxu0 %v3923_v56  ;;  %v3941_v9 = vld [vmem:[%s4770_s1 + $0xa8] ss:$12 sps:$4 sm:$0xff]   ;;  %v4875_v11 = vld [vmem:[#allocation2 + $0x8] sm:$0xff]  ;;  %v3947_v12 = vld [vmem:[%s4770_s1 + $0x80] ss:$12 sps:$4 sm:$0xff]   ;;  %vm4358_vm3 = vmmov 0  }
 0x392   : > { %1292 = vmatprep.subr.bf16.mxu0 %v3924_v57  ;;  %3570 = vmatpush3.bf16.msra.mxu1 %v3943_v63  ;;  %v4873_v10 = vld [vmem:[#allocation2] sm:$0xff]  ;;  %v3948_v14 = vld [vmem:[%s4770_s1 + $0x98] ss:$12 sps:$4 sm:$0xff]   ;;  %v4895_v17 = vshrl.u32 %v1145_v16, 7  ;;  %vm1414_vm4 = vcmask 261120   ;;  %vm1535_vm5 = vcmask 1043456  }
 0x393   : > { %3571 = vmatprep.subr.bf16.mxu1 %v4357_v54  ;;  %v1110_v13 = vpack.c.bf16 %v4875_v11, %v4873_v10  ;;  %v3949_v15 = vld [vmem:[%s4770_s1 + $0xb0] ss:$12 sps:$4 sm:$0xff]   ;;  %3583 = vmatprep.mubr.msk.bf16.mxu1 %vm4358_vm3, %v4357_v54  ;;  %v4359_v49 = vmov 1966171168   ;;  %s5356_s26 = sld [smem:[#allocation27_spill]]  ;;  %vm1507_vm6 = vcmask 64512  }
 0x394   : > { %v1151_v18 = vsub.s32 1, %v4895_v17  ;;  %v1143_v19 = vld [vmem:[%s4810_s24] sm:$0x7]  ;;  %v4900_v20 = vsub.s32 0, %v4895_v17  ;;  %v1155_v39 = vsub.s32 2, %v4895_v17  ;;  %v1385_v50 = vunpack.c.l.s4 %v4359_v49  ;;  %s4360_s6 = smov 96  }
 0x395   : > { %1293 = vmatpush1.bf16.msra.mxu0 %v3926_v58  ;;  %s4361_s21 = smov 64   ;;  %s4362_s25 = smov 32   ;;  %vm2317_vm7 = vcmask 523264   ;;  %vm2320_vm8 = vcmask 785408  }
 0x396   : > { %1294 = vmatprep.subr.bf16.mxu0 %v3927_v59  ;;  %3572 = vmatpush3.bf16.msra.mxu1 %v3944_v2  ;;  %v1152_v21 = vrot.slane %v1143_v19, %v1151_v18  ;;  %v1148_v22 = vrot.slane %v1143_v19, %v4900_v20  ;;  %v1156_v40 = vrot.slane %v1143_v19, %v1155_v39  ;;  %v1386_v51 = vunpack.c.0.s8 %v1385_v50  ;;  %s5358_s18 = sld [smem:[#allocation36_spill]]  ;;  %s5360_s12 = sld [smem:[#allocation37_spill]] }
 0x397   : > { %3573 = vmatprep.subr.bf16.mxu1 %v4357_v54  ;;  %p3433_p5 = scmp.ne.s32.totalorder %s4620_s4, 1 }
 0x398   : > { %v1389_v52 = vsub.s32 %v1386_v51, %v4895_v17  ;;  %vm3050_vm14 = vcmask (!%p3433_p5), 7168   ;;  %vm3071_vm15 = vcmask (!%p3433_p5), 0  }
 0x399   : > { %1295 = vmatpush1.bf16.msra.mxu0 %v3929_v60  ;;  %v3370_v55 = vld.sshfl [vmem:[%s5356_s26] sm:$0x11 pattern:$0x75316420] }
 0x39a   : > { %1296 = vmatprep.subr.bf16.mxu0 %v3930_v61  ;;  %3574 = vmatpush3.bf16.msra.mxu1 %v3945_v5  ;;  %v1390_v56 = vrot.slane %v3370_v55, %v1389_v52  ;;  %v1383_v58 = vcombine.high %v3370_v55, %v3370_v55 }
 0x39b   : > { %3575 = vmatprep.subr.bf16.mxu1 %v4357_v54 }
 0x39c   : > { %v4938_v57 = vrot.slane %v1390_v56, %v4900_v20  ;;  %v1397_v62 = vrot.slane %v1383_v58, %v1389_v52  ;;  %s5361_s17 = scalar_lea.vmem %s5360_s12, %s4792_s11 }
 0x39d   : > { %1297 = vmatpush1.bf16.msra.mxu0 %v3932_v0 }
 0x39e   : > { %1298 = vmatprep.subr.bf16.mxu0 %v3933_v1  ;;  %3576 = vmatpush3.bf16.msra.mxu1 %v3946_v8  ;;  %v4943_v2 = vrot.slane %v1397_v62, %v4900_v20 }
 0x39f   : > { %3577 = vmatprep.subr.bf16.mxu1 %v4357_v54 }
 0x3a1   : > { %1299 = vmatpush1.bf16.msra.mxu0 %v3935_v3 }
 0x3a2   : > { %1300 = vmatprep.subr.bf16.mxu0 %v3936_v4  ;;  %3578 = vmatpush3.bf16.msra.mxu1 %v3947_v12 }
 0x3a3   : > { %3579 = vmatprep.subr.bf16.mxu1 %v4357_v54 }
 0x3a5   : > { %1301 = vmatpush1.bf16.msra.mxu0 %v3938_v6 }
 0x3a6   : > { %1302 = vmatprep.subr.bf16.mxu0 %v3939_v7  ;;  %3580 = vmatpush3.bf16.msra.mxu1 %v3948_v14 }
 0x3a7   : > { %3581 = vmatprep.subr.bf16.mxu1 %v4357_v54 }
 0x3a9   : > { %1303 = vmatpush1.bf16.msra.mxu0 %v3941_v9 }
 0x3aa   : > { %3611 = vmatprep.subr.bf16.mxu0 %v4357_v54  ;;  %3582 = vmatpush3.bf16.msra.mxu1 %v3949_v15 }
 0x3ab   : > { %3587 = vmatprep.subr.bf16.mxu1 %v4357_v54 }
 0x3ac   : > { %1321 = vmatmul.mubr.bf16.vlgmr.msra.gmra.mrb[0].mxu0 %v1110_v13 }
 0x3ad   : > { %3613 = vmatprep.mubr.msk.bf16.mxu0 %vm4358_vm3, %v4357_v54  ;;  %3584 = vmatmul.mubr.bf16.vlgmr.msra.gmra.mrb[0].mxu1 %v1110_v13 }
 0x3ae   : > { %3589 = vmatprep.mubr.msk.bf16.mxu1 %vm4358_vm3, %v4357_v54 }
 0x47f   : > { %v1322_v23 = vpop.f32.mrb[0].mxu0 }
 0x480   : > { %v1324_v24 = vpop.f32.mrb[1].mxu0  ;;  %v1323_v28 = vadd.f32 %v1322_v23, %v1148_v22  ;;  %v1365_v41 = vpop.f32.mrb[0].mxu1 }
 0x481   : > { %v1325_v25 = vadd.f32 %v1324_v24, %v1152_v21  ;;  %v1326_v26 = vpop.f32.mrb[2].mxu0  ;;  %v1366_v42 = vadd.f32 %v1365_v41, %v1156_v40  ;;  %v3585_v43 = vpop.f32.mrb[1].mxu1 }
 0x482   : > { %v1328_v27 = vpop.f32.mrb[3].mxu0  ;;  %v1372_v32 = vmul.f32 0.17677669, %v1323_v28  ;;  %v1327_v35 = vadd.f32 %v1326_v26, %v1148_v22  ;;  %v1368_v44 = vpop.f32.mrb[2].mxu1 }
 0x483   : > { %v4905_v29 = vpack.c.bf16 %v1325_v25, %v1325_v25  ;;  %v1329_v30 = vadd.f32 %v1328_v27, %v1152_v21  ;;  %v4928_v45 = vpack.c.bf16 %v1366_v42, %v1366_v42  ;;  %v1369_v46 = vadd.f32 %v1368_v44, %v1156_v40  ;;  %v3586_v47 = vpop.f32.mrb[3].mxu1 }
 0x484   : > { %v4912_v34 = vpack.c.bf16 %v1372_v32, %v1372_v32  ;;  %v1373_v37 = vmul.f32 0.17677669, %v1327_v35 }
 0x485   : > { %v1419_v31 = vsel %vm1414_vm4, %v4905_v29, 0  ;;  %v4910_v33 = vpack.c.bf16 %v1329_v30, %v1329_v30  ;;  %v1537_v48 = vsel %vm1535_vm5, %v4928_v45, 0  ;;  %v4959_v30 = vpack.c.bf16 %v1369_v46, %v1369_v46 }
 0x486   : > { %3588 = vmatpush3.bf16.xpose.msra.mxu1 %v1419_v31  ;;  %v4921_v38 = vpack.c.bf16 %v1373_v37, %v1373_v37 }
 0x487   : > { %3593 = vmatprep.subr.bf16.mxu1 %v4357_v54  ;;  %v1465_v36 = vsel %vm1414_vm4, %v4910_v33, 0  ;;  %v1583_v35 = vsel %vm1535_vm5, %v4959_v30, 0 }
 0x48d   : > { %3590 = vmatmul.mubr.msk.bf16.vlgmr.msra.gmra.mrb[4].mxu1 %vm1414_vm4, %v4912_v34 }
 0x48e   : > { %3594 = vmatpush3.bf16.xpose.msra.mxu1 %v1465_v36  ;;  %3595 = vmatprep.mubr.msk.bf16.mxu1 %vm4358_vm3, %v4357_v54 }
 0x48f   : > { %3599 = vmatprep.subr.bf16.mxu1 %v4357_v54 }
 0x495   : > { %3596 = vmatmul.mubr.msk.bf16.vlgmr.msra.gmra.mrb[8].mxu1 %vm1414_vm4, %v4921_v38 }
 0x496   : > { %3601 = vmatprep.mubr.msk.bf16.mxu1 %vm4358_vm3, %v4357_v54  ;;  %3600 = vmatpush3.bf16.msra.mxu1 %v1537_v48 }
 0x497   : > { %3605 = vmatprep.subr.bf16.mxu1 %v4357_v54 }
 0x560   : > { %v1455_v59 = vpop.f32.mrb[4].mxu1 }
 0x561   : > { %v1456_v60 = vadd.f32 %v1455_v59, %v4938_v57  ;;  %v3591_v61 = vpop.f32.mrb[5].mxu1 }
 0x562   : > { %v1458_v63 = vpop.f32.mrb[6].mxu1 }
 0x563   : > { %v3592_v0 = vpop.f32.mrb[7].mxu1  ;;  %v1508_v1 = vsel %vm1507_vm6, %v1456_v60, -inf }
 0x564   : > { %1509 = vmax.xlane.f32.xlu0 %v1508_v1 }
 0x568   : > { %v1501_v3 = vpop.f32.mrb[8].mxu1 }
 0x569   : > { %v1502_v4 = vadd.f32 %v1501_v3, %v4943_v2  ;;  %v3597_v5 = vpop.f32.mrb[9].mxu1 }
 0x56a   : > { %v1504_v6 = vpop.f32.mrb[10].mxu1 }
 0x56b   : > { %v3598_v7 = vpop.f32.mrb[11].mxu1  ;;  %v1511_v8 = vsel %vm1507_vm6, %v1502_v4, -inf }
 0x56c   : > { %1512 = vmax.xlane.f32.xlu0 %v1511_v8 }
 0x582   : > { %1629 = vrot.lane.b32.xlu0 %v4905_v29, %s4360_s6 }
 0x5f1   : > { %v1510_v9 = vpop.xlane.xlu0 %1509 }
 0x5f2   : > { %v1514_v12 = vsub.f32 %v1456_v60, %v1510_v9 }
 0x5f4   : > { %v1516_v13 = vmul.f32 1.442695, %v1514_v12 }
 0x5f6   : > { %3998 = vpow2.f32 %v1516_v13 }
 0x5f9   : > { %v1513_v14 = vpop.xlane.xlu0 %1512 }
 0x5fa   : > { %v1515_v23 = vsub.f32 %v1502_v4, %v1513_v14 }
 0x5fc   : > { %v1518_v24 = vmul.f32 1.442695, %v1515_v23 }
 0x5fd   : > { %v1630_v15 = vpop.permute.xlu0 %1629 }
 0x5fe   : > { %v1635_v19 = vsel %vm1414_vm4, %v1630_v15, 0  ;;  %4000 = vpow2.f32 %v1518_v24 }
 0x5ff   : > { %3612 = vmatpush3.bf16.xpose.msra.mxu0 %v1635_v19 }
 0x600   : > { %v3999_v21 = vpop.eup %3998  ;;  %3623 = vmatprep.subr.bf16.mxu0 %v4357_v54 }
 0x601   : > { %v1520_v22 = vsel %vm1507_vm6, %v3999_v21, 0.0 }
 0x602   : > { %1521 = vadd.xlane.f32.xlu1 %v1520_v22 }
 0x608   : > { %v4001_v25 = vpop.eup %4000 }
 0x609   : > { %v1523_v26 = vsel %vm1507_vm6, %v4001_v25, 0.0 }
 0x613   : > { %1681 = vrot.lane.b32.xlu1 %v4910_v33, %s4360_s6 }
 0x637   : > { %1524 = vadd.xlane.f32.xlu1 %v1523_v26 }
 0x648   : > { %1626 = vrot.lane.b32.xlu1 %v4912_v34, %s4360_s6 }
 0x64c   : > { %1678 = vrot.lane.b32.xlu1 %v4921_v38, %s4360_s6 }
 0x68f   : > { %v1522_v27 = vpop.xlane.xlu1 %1521 }
 0x690   : > { %4002 = vrcp.f32 %v1522_v27 }
 0x693   : > { %v1682_v36 = vpop.permute.xlu1 %1681 }
 0x694   : > { %v1687_v43 = vsel %vm1414_vm4, %v1682_v36, 0 }
 0x69a   : > { %v4003_v28 = vpop.eup %4002 }
 0x69b   : > { %v1528_v31 = vmul.f32 %v4003_v28, %v3999_v21 }
 0x69d   : > { %v1530_v32 = vpack.c.bf16 %v1528_v31, %v1528_v31 }
 0x69f   : > { %3602 = vmatmul.mubr.msk.bf16.vlgmr.msra.gmra.mrb[12].mxu1 %vm1507_vm6, %v1530_v32 }
 0x6a0   : > { %3606 = vmatpush3.bf16.msra.mxu1 %v1583_v35  ;;  %3607 = vmatprep.mubr.msk.bf16.mxu1 %vm4358_vm3, %v4357_v54 }
 0x6a1   : > { %3617 = vmatprep.subr.bf16.mxu1 %v4357_v54 }
 0x6c4   : > { %v1525_v37 = vpop.xlane.xlu1 %1524 }
 0x6c5   : > { %4004 = vrcp.f32 %v1525_v37 }
 0x6c8   : > { %v1627_v39 = vpop.permute.xlu1 %1626 }
 0x6c9   : > { %3614 = vmatmul.mubr.msk.bf16.vlgmr.msra.gmra.mrb[4].mxu0 %vm1414_vm4, %v1627_v39 }
 0x6ca   : > { %3625 = vmatprep.mubr.msk.bf16.mxu0 %vm4358_vm3, %v4357_v54 }
 0x6cc   : > { %v1679_v44 = vpop.permute.xlu1 %1678 }
 0x6cf   : > { %v4005_v40 = vpop.eup %4004 }
 0x6d0   : > { %v1529_v41 = vmul.f32 %v4005_v40, %v4001_v25 }
 0x6d2   : > { %v1531_v42 = vpack.c.bf16 %v1529_v41, %v1529_v41 }
 0x6d4   : > { %3608 = vmatmul.mubr.msk.bf16.vlgmr.msra.gmra.mrb[16].mxu1 %vm1507_vm6, %v1531_v42 }
 0x6d5   : > { %3618 = vmatpush3.bf16.xpose.msra.mxu1 %v1687_v43  ;;  %3619 = vmatprep.mubr.msk.bf16.mxu1 %vm4358_vm3, %v4357_v54 }
 0x6d6   : > { %3629 = vmatprep.subr.bf16.mxu1 %v4357_v54 }
 0x6dc   : > { %3620 = vmatmul.mubr.msk.bf16.vlgmr.msra.gmra.mrb[20].mxu1 %vm1414_vm4, %v1679_v44 }
 0x6dd   : > { %3631 = vmatprep.mubr.msk.bf16.mxu1 %vm4358_vm3, %v4357_v54 }
 0x772   : > { %v4978_v46 = vpop.f32.mrb[12].mxu1 }
 0x773   : > { %v3603_v47 = vpop.f32.mrb[13].mxu1 }
 0x774   : > { %v1576_v48 = vpop.f32.mrb[14].mxu1 }
 0x775   : > { %v3604_v49 = vpop.f32.mrb[15].mxu1 }
 0x79c   : > { %v1671_v50 = vpop.f32.mrb[4].mxu0 }
 0x79d   : > { %v1672_v51 = vadd.f32 %v1671_v50, %v4938_v57  ;;  %v3615_v52 = vpop.f32.mrb[5].mxu0 }
 0x79e   : > { %v1674_v55 = vpop.f32.mrb[6].mxu0 }
 0x79f   : > { %v3616_v56 = vpop.f32.mrb[7].mxu0  ;;  %v1729_v58 = vsel %vm1507_vm6, %v1672_v51, -inf }
 0x7a0   : > { %1730 = vmax.xlane.f32.xlu0 %v1729_v58 }
 0x7a7   : > { %v4982_v59 = vpop.f32.mrb[16].mxu1 }
 0x7a8   : > { %v3609_v60 = vpop.f32.mrb[17].mxu1 }
 0x7a9   : > { %v1622_v61 = vpop.f32.mrb[18].mxu1 }
 0x7aa   : > { %v3610_v62 = vpop.f32.mrb[19].mxu1 }
 0x7af   : > { %v1723_v63 = vpop.f32.mrb[20].mxu1 }
 0x7b0   : > { %v1724_v0 = vadd.f32 %v1723_v63, %v4943_v2  ;;  %v3621_v1 = vpop.f32.mrb[21].mxu1 }
 0x7b1   : > { %v1726_v3 = vpop.f32.mrb[22].mxu1 }
 0x7b2   : > { %v3622_v4 = vpop.f32.mrb[23].mxu1  ;;  %v1732_v5 = vsel %vm1507_vm6, %v1724_v0, -inf }
 0x7b3   : > { %1733 = vmax.xlane.f32.xlu1 %v1732_v5 }
 0x7c4   : > { %1803 = vrot.lane.b32.xlu1 %v4959_v30, %s4360_s6 }
 0x7c8   : > { %1853 = vrot.lane.b32.xlu1 %v4905_v29, %s4361_s21 }
 0x7cc   : > { %1903 = vrot.lane.b32.xlu1 %v4910_v33, %s4361_s21 }
 0x7d0   : > { %1901 = vrot.lane.b32.xlu1 %v4921_v38, %s4361_s21 }
 0x82d   : > { %v1731_v6 = vpop.xlane.xlu0 %1730 }
 0x82e   : > { %v1735_v7 = vsub.f32 %v1672_v51, %v1731_v6 }
 0x830   : > { %v1737_v8 = vmul.f32 1.442695, %v1735_v7 }
 0x832   : > { %4006 = vpow2.f32 %v1737_v8 }
 0x83c   : > { %v4007_v9 = vpop.eup %4006 }
 0x83d   : > { %v1741_v12 = vsel %vm1507_vm6, %v4007_v9, 0.0 }
 0x83e   : > { %1742 = vadd.xlane.f32.xlu0 %v1741_v12 }
 0x840   : > { %v1734_v13 = vpop.xlane.xlu1 %1733 }
 0x841   : > { %v1736_v14 = vsub.f32 %v1724_v0, %v1734_v13 }
 0x843   : > { %v1739_v15 = vmul.f32 1.442695, %v1736_v14 }
 0x844   : > { %v1804_v19 = vpop.permute.xlu1 %1803 }
 0x845   : > { %4008 = vpow2.f32 %v1739_v15  ;;  %v1809_v21 = vsel %vm1535_vm5, %v1804_v19, 0 }
 0x846   : > { %3630 = vmatpush3.bf16.msra.mxu1 %v1809_v21 }
 0x847   : > { %3641 = vmatprep.subr.bf16.mxu1 %v4357_v54 }
 0x848   : > { %v1854_v32 = vpop.permute.xlu1 %1853 }
 0x849   : > { %v1859_v40 = vsel %vm1414_vm4, %v1854_v32, 0 }
 0x84c   : > { %v1904_v39 = vpop.permute.xlu1 %1903 }
 0x84d   : > { %v1909_v42 = vsel %vm1414_vm4, %v1904_v39, 0 }
 0x84f   : > { %v4009_v22 = vpop.eup %4008 }
 0x850   : > { %v1744_v23 = vsel %vm1507_vm6, %v4009_v22, 0.0  ;;  %v1902_v44 = vpop.permute.xlu1 %1901 }
 0x851   : > { %1745 = vadd.xlane.f32.xlu0 %v1744_v23 }
 0x867   : > { %1754 = vrot.lane.b32.xlu0 %v4928_v45, %s4360_s6 }
 0x86b   : > { %1851 = vrot.lane.b32.xlu0 %v4912_v34, %s4361_s21 }
 0x8cb   : > { %v1743_v24 = vpop.xlane.xlu0 %1742 }
 0x8cc   : > { %4010 = vrcp.f32 %v1743_v24 }
 0x8d6   : > { %v4011_v25 = vpop.eup %4010 }
 0x8d7   : > { %v1749_v27 = vmul.f32 %v4011_v25, %v4007_v9 }
 0x8d9   : > { %v1751_v35 = vpack.c.bf16 %v1749_v27, %v1749_v27 }
 0x8de   : > { %v1746_v26 = vpop.xlane.xlu0 %1745 }
 0x8df   : > { %4012 = vrcp.f32 %v1746_v26 }
 0x8e2   : > { %v1755_v28 = vpop.permute.xlu0 %1754 }
 0x8e3   : > { %v1760_v31 = vsel %vm1535_vm5, %v1755_v28, 0 }
 0x8e4   : > { %3624 = vmatpush3.bf16.msra.mxu0 %v1760_v31 }
 0x8e5   : > { %3635 = vmatprep.subr.bf16.mxu0 %v4357_v54 }
 0x8e6   : > { %v1852_v43 = vpop.permute.xlu0 %1851 }
 0x8e7   : > { %3626 = vmatmul.mubr.msk.bf16.vlgmr.msra.gmra.mrb[8].mxu0 %vm1507_vm6, %v1751_v35 }
 0x8e8   : > { %3637 = vmatprep.mubr.msk.bf16.mxu0 %vm4358_vm3, %v4357_v54 }
 0x8e9   : > { %v4013_v36 = vpop.eup %4012 }
 0x8ea   : > { %v1750_v37 = vmul.f32 %v4013_v36, %v4009_v22 }
 0x8ec   : > { %v1752_v41 = vpack.c.bf16 %v1750_v37, %v1750_v37 }
 0x8ed   : > { %3636 = vmatpush3.bf16.xpose.msra.mxu0 %v1859_v40 }
 0x8ee   : > { %3632 = vmatmul.mubr.msk.bf16.vlgmr.msra.gmra.mrb[24].mxu1 %vm1507_vm6, %v1752_v41  ;;  %3647 = vmatprep.subr.bf16.mxu0 %v4357_v54 }
 0x8ef   : > { %3642 = vmatpush3.bf16.xpose.msra.mxu1 %v1909_v42  ;;  %3643 = vmatprep.mubr.msk.bf16.mxu1 %vm4358_vm3, %v4357_v54 }
 0x8f0   : > { %3653 = vmatprep.subr.bf16.mxu1 %v4357_v54 }
 0x8f4   : > { %3638 = vmatmul.mubr.msk.bf16.vlgmr.msra.gmra.mrb[12].mxu0 %vm1414_vm4, %v1852_v43 }
 0x8f5   : > { %3649 = vmatprep.mubr.msk.bf16.mxu0 %vm4358_vm3, %v4357_v54 }
 0x8f6   : > { %3644 = vmatmul.mubr.msk.bf16.vlgmr.msra.gmra.mrb[28].mxu1 %vm1414_vm4, %v1902_v44 }
 0x8f7   : > { %3655 = vmatprep.mubr.msk.bf16.mxu1 %vm4358_vm3, %v4357_v54 }
 0x9ba   : > { %v5020_v47 = vpop.f32.mrb[8].mxu0 }
 0x9bb   : > { %v3627_v48 = vpop.f32.mrb[9].mxu0 }
 0x9bc   : > { %v1799_v49 = vpop.f32.mrb[10].mxu0 }
 0x9bd   : > { %v3628_v50 = vpop.f32.mrb[11].mxu0 }
 0x9c1   : > { %v5022_v51 = vpop.f32.mrb[24].mxu1 }
 0x9c2   : > { %v3903_v52 = vpack.i.bf16 %v5022_v51, %v5020_v47  ;;  %v3633_v55 = vpop.f32.mrb[25].mxu1 }
 0x9c3   : > { %v1848_v56 = vpop.f32.mrb[26].mxu1 }
 0x9c4   : > { %v3634_v58 = vpop.f32.mrb[27].mxu1 }
 0x9c7   : > { %v1895_v60 = vpop.f32.mrb[12].mxu0 }
 0x9c8   : > { %v1896_v61 = vadd.f32 %v1895_v60, %v4938_v57  ;;  %v3639_v62 = vpop.f32.mrb[13].mxu0 }
 0x9c9   : > { %v1898_v63 = vpop.f32.mrb[14].mxu0  ;;  %v1945_v0 = vpop.f32.mrb[28].mxu1 }
 0x9ca   : > { %v1946_v1 = vadd.f32 %v1945_v0, %v4943_v2  ;;  %v3640_v3 = vpop.f32.mrb[15].mxu0  ;;  %v3645_v4 = vpop.f32.mrb[29].mxu1  ;;  %v1951_v5 = vsel %vm1507_vm6, %v1896_v61, -inf }
 0x9cb   : > { %1952 = vmax.xlane.f32.xlu0 %v1951_v5  ;;  %v1948_v6 = vpop.f32.mrb[30].mxu1 }
 0x9cc   : > { %v3646_v7 = vpop.f32.mrb[31].mxu1  ;;  %v1954_v8 = vsel %vm1507_vm6, %v1946_v1, -inf }
 0x9cd   : > { %1955 = vmax.xlane.f32.xlu1 %v1954_v8 }
 0x9de   : > { %2023 = vrot.lane.b32.xlu1 %v4959_v30, %s4361_s21 }
 0x9e2   : > { %2073 = vrot.lane.b32.xlu1 %v4905_v29, %s4362_s25 }
 0x9e6   : > { %2123 = vrot.lane.b32.xlu1 %v4910_v33, %s4362_s25 }
 0x9ea   : > { %2121 = vrot.lane.b32.xlu1 %v4921_v38, %s4362_s25 }
 0xa58   : > { %v1953_v9 = vpop.xlane.xlu0 %1952 }
 0xa59   : > { %v1957_v12 = vsub.f32 %v1896_v61, %v1953_v9 }
 0xa5a   : > { %v1956_v13 = vpop.xlane.xlu1 %1955 }
 0xa5b   : > { %v1959_v14 = vmul.f32 1.442695, %v1957_v12  ;;  %v1958_v15 = vsub.f32 %v1946_v1, %v1956_v13 }
 0xa5d   : > { %4014 = vpow2.f32 %v1959_v14  ;;  %v1961_v19 = vmul.f32 1.442695, %v1958_v15 }
 0xa5e   : > { %v2024_v21 = vpop.permute.xlu1 %2023 }
 0xa5f   : > { %4016 = vpow2.f32 %v1961_v19  ;;  %v2029_v22 = vsel %vm1535_vm5, %v2024_v21, 0 }
 0xa60   : > { %3654 = vmatpush3.bf16.msra.mxu1 %v2029_v22 }
 0xa61   : > { %3665 = vmatprep.subr.bf16.mxu1 %v4357_v54 }
 0xa62   : > { %v2074_v31 = vpop.permute.xlu1 %2073 }
 0xa66   : > { %v2124_v39 = vpop.permute.xlu1 %2123 }
 0xa67   : > { %v4015_v29 = vpop.eup %4014  ;;  %v2129_v41 = vsel %vm1414_vm4, %v2124_v39, 0  ;;  %v3956_v39 = vld [vmem:[%s4776_s23 + $0x30] sm:$0xff]  }
 0xa68   : > { %v1963_v33 = vsel %vm1507_vm6, %v4015_v29, 0.0 }
 0xa69   : > { %v4017_v23 = vpop.eup %4016  ;;  %1964 = vadd.xlane.f32.xlu0 %v1963_v33 }
 0xa6a   : > { %v1966_v38 = vsel %vm1507_vm6, %v4017_v23, 0.0  ;;  %v2122_v43 = vpop.permute.xlu1 %2121 }
 0xa6d   : > { %1967 = vadd.xlane.f32.xlu0 %v1966_v38 }
 0xa83   : > { %1975 = vrot.lane.b32.xlu0 %v4928_v45, %s4361_s21 }
 0xa87   : > { %2071 = vrot.lane.b32.xlu0 %v4912_v34, %s4362_s25  ;;  %v2079_v34 = vsel %vm1414_vm4, %v2074_v31, 0  ;;  %v3950_v31 = vld [vmem:[%s4776_s23] sm:$0xff]  }
 0xaf6   : > { %v1965_v24 = vpop.xlane.xlu0 %1964 }
 0xaf7   : > { %4018 = vrcp.f32 %v1965_v24 }
 0xafa   : > { %v1968_v25 = vpop.xlane.xlu0 %1967 }
 0xafb   : > { %4020 = vrcp.f32 %v1968_v25 }
 0xafe   : > { %v1976_v26 = vpop.permute.xlu0 %1975 }
 0xaff   : > { %v1981_v27 = vsel %vm1535_vm5, %v1976_v26, 0 }
 0xb00   : > { %3648 = vmatpush3.bf16.msra.mxu0 %v1981_v27 }
 0xb01   : > { %v4019_v28 = vpop.eup %4018  ;;  %3659 = vmatprep.subr.bf16.mxu0 %v4357_v54 }
 0xb02   : > { %v1971_v32 = vmul.f32 %v4019_v28, %v4015_v29  ;;  %v2072_v42 = vpop.permute.xlu0 %2071 }
 0xb04   : > { %v1973_v35 = vpack.c.bf16 %v1971_v32, %v1971_v32  ;;  %v3951_v32 = vld [vmem:[%s4776_s23 + $0x8] sm:$0xff]  }
 0xb05   : > { %v4021_v36 = vpop.eup %4020 }
 0xb06   : > { %v1972_v37 = vmul.f32 %v4021_v36, %v4017_v23  ;;  %3650 = vmatmul.mubr.msk.bf16.vlgmr.msra.gmra.mrb[16].mxu0 %vm1507_vm6, %v1973_v35  ;;  %v3952_v35 = vld [vmem:[%s4776_s23 + $0x10] sm:$0xff]   ;;  %v3953_v36 = vld [vmem:[%s4776_s23 + $0x18] sm:$0xff]  }
 0xb07   : > { %3661 = vmatprep.mubr.msk.bf16.mxu0 %vm4358_vm3, %v4357_v54 }
 0xb08   : > { %v1974_v40 = vpack.c.bf16 %v1972_v37, %v1972_v37  ;;  %v3954_v37 = vld [vmem:[%s4776_s23 + $0x20] sm:$0xff]  }
 0xb09   : > { %3660 = vmatpush3.bf16.xpose.msra.mxu0 %v2079_v34  ;;  %v3957_v34 = vld [vmem:[%s4776_s23 + $0x38] sm:$0xff]  }
 0xb0a   : > { %3656 = vmatmul.mubr.msk.bf16.vlgmr.msra.gmra.mrb[32].mxu1 %vm1507_vm6, %v1974_v40  ;;  %3671 = vmatprep.subr.bf16.mxu0 %v4357_v54 }
 0xb0b   : > { %3666 = vmatpush3.bf16.xpose.msra.mxu1 %v2129_v41  ;;  %3667 = vmatprep.mubr.msk.bf16.mxu1 %vm4358_vm3, %v4357_v54 }
 0xb0c   : > { %3677 = vmatprep.subr.bf16.mxu1 %v4357_v54 }
 0xb10   : > { %3662 = vmatmul.mubr.msk.bf16.vlgmr.msra.gmra.mrb[20].mxu0 %vm1414_vm4, %v2072_v42 }
 0xb11   : > { %3673 = vmatprep.mubr.msk.bf16.mxu0 %vm4358_vm3, %v4357_v54 }
 0xb12   : > { %3668 = vmatmul.mubr.msk.bf16.vlgmr.msra.gmra.mrb[36].mxu1 %vm1414_vm4, %v2122_v43 }
 0xb13   : > { %3679 = vmatprep.mubr.msk.bf16.mxu1 %vm4358_vm3, %v4357_v54 }
 0xbd9   : > { %v2017_v44 = vpop.f32.mrb[16].mxu0 }
 0xbda   : > { %v3651_v48 = vpop.f32.mrb[17].mxu0 }
 0xbdb   : > { %v2020_v49 = vpop.f32.mrb[18].mxu0 }
 0xbdc   : > { %v3652_v50 = vpop.f32.mrb[19].mxu0 }
 0xbdd   : > { %v2065_v55 = vpop.f32.mrb[32].mxu1 }
 0xbde   : > { %v3908_v56 = vpack.i.bf16 %v2065_v55, %v2017_v44  ;;  %v3657_v58 = vpop.f32.mrb[33].mxu1 }
 0xbdf   : > { %v2068_v60 = vpop.f32.mrb[34].mxu1 }
 0xbe0   : > { %v3658_v61 = vpop.f32.mrb[35].mxu1 }
 0xbe3   : > { %v2115_v62 = vpop.f32.mrb[20].mxu0 }
 0xbe4   : > { %v2116_v63 = vadd.f32 %v2115_v62, %v4938_v57  ;;  %v3663_v0 = vpop.f32.mrb[21].mxu0 }
 0xbe5   : > { %v2118_v1 = vpop.f32.mrb[22].mxu0  ;;  %v2165_v3 = vpop.f32.mrb[36].mxu1 }
 0xbe6   : > { %v2166_v4 = vadd.f32 %v2165_v3, %v4943_v2  ;;  %v3664_v5 = vpop.f32.mrb[23].mxu0  ;;  %v3669_v6 = vpop.f32.mrb[37].mxu1  ;;  %v2171_v7 = vsel %vm1507_vm6, %v2116_v63, -inf }
 0xbe7   : > { %2172 = vmax.xlane.f32.xlu0 %v2171_v7  ;;  %v2168_v8 = vpop.f32.mrb[38].mxu1 }
 0xbe8   : > { %v3670_v9 = vpop.f32.mrb[39].mxu1  ;;  %v2174_v12 = vsel %vm1507_vm6, %v2166_v4, -inf }
 0xbe9   : > { %2175 = vmax.xlane.f32.xlu1 %v2174_v12  ;;  %v3387_v12 = vld [vmem:[%s5357_s5] ss:$0 sm:$0xff] }
 0xbfa   : > { %2243 = vrot.lane.b32.xlu1 %v4959_v30, %s4362_s25 }
 0xbfe   : > { %3904 = vrot.lane.b32.xlu1 %v3903_v52, %s4362_s25 }
 0xc02   : > { %3909 = vrot.lane.b32.xlu1 %v3908_v56, %s4361_s21 }
 0xc74   : > { %v2173_v57 = vpop.xlane.xlu0 %2172 }
 0xc75   : > { %v2177_v2 = vsub.f32 %v2116_v63, %v2173_v57 }
 0xc76   : > { %v2176_v13 = vpop.xlane.xlu1 %2175 }
 0xc77   : > { %v2179_v14 = vmul.f32 1.442695, %v2177_v2  ;;  %v2178_v15 = vsub.f32 %v2166_v4, %v2176_v13 }
 0xc79   : > { %4022 = vpow2.f32 %v2179_v14  ;;  %v2181_v19 = vmul.f32 1.442695, %v2178_v15 }
 0xc7a   : > { %v2244_v21 = vpop.permute.xlu1 %2243 }
 0xc7b   : > { %4024 = vpow2.f32 %v2181_v19  ;;  %v2249_v22 = vsel %vm1535_vm5, %v2244_v21, 0  ;;  %v3958_v21 = vld [vmem:[%s4778_s8] ss:$8 sps:$4 sm:$0xff]  }
 0xc7c   : > { %3678 = vmatpush3.bf16.msra.mxu1 %v2249_v22  ;;  %v3960_v22 = vld [vmem:[%s4778_s8 + $0x4] ss:$8 sps:$4 sm:$0xff]  }
 0xc7d   : > { %2588 = vmatprep.subr.bf16.mxu1 %v3960_v22 }
 0xc7e   : > { %v3905_v56 = vpop.permute.xlu1 %3904 }
 0xc7f   : > { %v3907_v60 = vunpack.i.h.bf16 %v3905_v56  ;;  %v3906_v61 = vunpack.i.l.bf16 %v3905_v56 }
 0xc81   : > { %v2316_v0 = vsel %vm1414_vm4, %v4982_v59, %v3907_v60  ;;  %v2315_v1 = vsel %vm1414_vm4, %v4978_v46, %v3906_v61 }
 0xc82   : > { %v3910_v58 = vpop.permute.xlu1 %3909 }
 0xc83   : > { %v4023_v30 = vpop.eup %4022  ;;  %v3912_v62 = vunpack.i.h.bf16 %v3910_v58 }
 0xc84   : > { %v2183_v29 = vsel %vm1507_vm6, %v4023_v30, 0.0 }
 0xc85   : > { %v4025_v33 = vpop.eup %4024  ;;  %2184 = vadd.xlane.f32.xlu0 %v2183_v29  ;;  %v2319_v6 = vsel %vm2317_vm7, %v2316_v0, %v3912_v62  ;;  %v3961_v29 = vld [vmem:[%s4778_s8 + $0x10] ss:$8 sps:$4 sm:$0xff]   ;;  %v3983_v0 = vld [vmem:[%s4784_s16] sm:$0xff]  }
 0xc86   : > { %v2186_v47 = vsel %vm1507_vm6, %v4025_v33, 0.0 }
 0xc89   : > { %2187 = vadd.xlane.f32.xlu0 %v2186_v47 }
 0xc9f   : > { %2195 = vrot.lane.b32.xlu0 %v4928_v45, %s4362_s25 }
 0xd12   : > { %v2185_v51 = vpop.xlane.xlu0 %2184 }
 0xd13   : > { %4026 = vrcp.f32 %v2185_v51 }
 0xd16   : > { %v2188_v52 = vpop.xlane.xlu0 %2187 }
 0xd17   : > { %4028 = vrcp.f32 %v2188_v52 }
 0xd1a   : > { %v2196_v23 = vpop.permute.xlu0 %2195 }
 0xd1b   : > { %v2201_v38 = vsel %vm1535_vm5, %v2196_v23, 0 }
 0xd1c   : > { %3672 = vmatpush3.bf16.msra.mxu0 %v2201_v38 }
 0xd1d   : > { %v4027_v24 = vpop.eup %4026  ;;  %3683 = vmatprep.subr.bf16.mxu0 %v4357_v54 }
 0xd1e   : > { %v2191_v25 = vmul.f32 %v4027_v24, %v4023_v30  ;;  %v3963_v30 = vld [vmem:[%s4778_s8 + $0x14] ss:$8 sps:$4 sm:$0xff]   ;;  %v3966_v24 = vld [vmem:[%s4778_s8 + $0x24] ss:$8 sps:$4 sm:$0xff]  }
 0xd20   : > { %v2193_v26 = vpack.c.bf16 %v2191_v25, %v2191_v25  ;;  %v3964_v25 = vld [vmem:[%s4778_s8 + $0x20] ss:$8 sps:$4 sm:$0xff]  }
 0xd21   : > { %v4029_v27 = vpop.eup %4028 }
 0xd22   : > { %v2192_v28 = vmul.f32 %v4029_v27, %v4025_v33  ;;  %3674 = vmatmul.mubr.msk.bf16.vlgmr.msra.gmra.mrb[24].mxu0 %vm1507_vm6, %v2193_v26  ;;  %v3969_v26 = vld [vmem:[%s4778_s8 + $0x34] ss:$8 sps:$4 sm:$0xff]   ;;  %v3967_v27 = vld [vmem:[%s4778_s8 + $0x30] ss:$8 sps:$4 sm:$0xff]  }
 0xd23   : > { %3699 = vmatprep.mubr.msk.bf16.mxu0 %vm4358_vm3, %v4357_v54  ;;  %3684 = vmatpush3.bf16.msra.mxu0 %v3950_v31  ;;  %v3975_v31 = vld [vmem:[%s4778_s8 + $0x54] ss:$8 sps:$4 sm:$0xff]  }
 0xd24   : > { %v2194_v45 = vpack.c.bf16 %v2192_v28, %v2192_v28  ;;  %3685 = vmatprep.subr.bf16.mxu0 %v4357_v54  ;;  %v3972_v28 = vld [vmem:[%s4778_s8 + $0x44] ss:$8 sps:$4 sm:$0xff]  }
 0xd26   : > { %3680 = vmatmul.mubr.msk.bf16.vlgmr.msra.gmra.mrb[40].mxu1 %vm1507_vm6, %v2194_v45  ;;  %v3970_v45 = vld [vmem:[%s4778_s8 + $0x40] ss:$8 sps:$4 sm:$0xff]  }
 0xd27   : > { %2620 = vmatprep.mubr.bf16.mxu1 %v4356_v53  ;;  %3686 = vmatpush3.bf16.msra.mxu0 %v3951_v32  ;;  %v3955_v53 = vld [vmem:[%s4776_s23 + $0x28] sm:$0xff]   ;;  %v3973_v32 = vld [vmem:[%s4778_s8 + $0x50] ss:$8 sps:$4 sm:$0xff]   ;;  %s5366_s23 = sld [smem:[#allocation28_spill]] (!%p3433_p5) }
 0xd28   : > { %3687 = vmatprep.subr.bf16.mxu0 %v4357_v54  ;;  %2589 = vmatpush1.bf16.msra.mxu1 %v3958_v21 }
 0xd29   : > { %2590 = vmatprep.subr.bf16.mxu1 %v3963_v30 }
 0xd2b   : > { %3688 = vmatpush3.bf16.msra.mxu0 %v3952_v35  ;;  %v3978_v35 = vld [vmem:[%s4778_s8 + $0x64] ss:$8 sps:$4 sm:$0xff]  }
 0xd2c   : > { %3689 = vmatprep.subr.bf16.mxu0 %v4357_v54  ;;  %2591 = vmatpush1.bf16.msra.mxu1 %v3961_v29 }
 0xd2d   : > { %2592 = vmatprep.subr.bf16.mxu1 %v3966_v24 }
 0xd2f   : > { %3690 = vmatpush3.bf16.msra.mxu0 %v3953_v36  ;;  %v3976_v36 = vld [vmem:[%s4778_s8 + $0x60] ss:$8 sps:$4 sm:$0xff]  }
 0xd30   : > { %3691 = vmatprep.subr.bf16.mxu0 %v4357_v54  ;;  %2593 = vmatpush1.bf16.msra.mxu1 %v3964_v25 }
 0xd31   : > { %2594 = vmatprep.subr.bf16.mxu1 %v3969_v26 }
 0xd33   : > { %3692 = vmatpush3.bf16.msra.mxu0 %v3954_v37  ;;  %v3981_v37 = vld [vmem:[%s4778_s8 + $0x74] ss:$8 sps:$4 sm:$0xff]  }
 0xd34   : > { %3693 = vmatprep.subr.bf16.mxu0 %v4357_v54  ;;  %2595 = vmatpush1.bf16.msra.mxu1 %v3967_v27 }
 0xd35   : > { %2596 = vmatprep.subr.bf16.mxu1 %v3972_v28 }
 0xd37   : > { %3694 = vmatpush3.bf16.msra.mxu0 %v3955_v53  ;;  %v3979_v53 = vld [vmem:[%s4778_s8 + $0x70] ss:$8 sps:$4 sm:$0xff]   ;;  %s5359_s8 = scalar_lea.vmem %s5358_s18, %s4792_s11 }
 0xd38   : > { %3695 = vmatprep.subr.bf16.mxu0 %v4357_v54  ;;  %2597 = vmatpush1.bf16.msra.mxu1 %v3970_v45 }
 0xd39   : > { %2598 = vmatprep.subr.bf16.mxu1 %v3975_v31 }
 0xd3b   : > { %3696 = vmatpush3.bf16.msra.mxu0 %v3956_v39 }
 0xd3c   : > { %3697 = vmatprep.subr.bf16.mxu0 %v4357_v54  ;;  %v3911_v54 = vunpack.i.l.bf16 %v3910_v58  ;;  %2599 = vmatpush1.bf16.msra.mxu1 %v3973_v32  ;;  %v3397_v58 = vld [vmem:[%s5361_s17] ss:$0 sm:$0xff] }
 0xd3d   : > { %2600 = vmatprep.subr.bf16.mxu1 %v3978_v35 }
 0xd3e   : > { %v2318_v5 = vsel %vm2317_vm7, %v2315_v1, %v3911_v54  ;;  %v3984_v1 = vld [vmem:[%s4784_s16 + $0x48] sm:$0xff]  }
 0xd3f   : > { %3698 = vmatpush3.bf16.msra.mxu0 %v3957_v34 }
 0xd40   : > { %2601 = vmatpush1.bf16.msra.mxu1 %v3976_v36 }
 0xd41   : > { %2602 = vmatprep.subr.bf16.mxu1 %v3981_v37 }
 0xd44   : > { %2603 = vmatpush1.bf16.msra.mxu1 %v3979_v53 }
 0xdf5   : > { %v2237_v40 = vpop.f32.mrb[24].mxu0 }
 0xdf6   : > { %v3675_v41 = vpop.f32.mrb[25].mxu0 }
 0xdf7   : > { %v2240_v42 = vpop.f32.mrb[26].mxu0 }
 0xdf8   : > { %v3676_v43 = vpop.f32.mrb[27].mxu0 }
 0xdf9   : > { %v2285_v44 = vpop.f32.mrb[40].mxu1 }
 0xdfa   : > { %v3913_v48 = vpack.i.bf16 %v2285_v44, %v2237_v40  ;;  %v3681_v49 = vpop.f32.mrb[41].mxu1 }
 0xdfb   : > { %v2288_v50 = vpop.f32.mrb[42].mxu1  ;;  %v3396_v49 = vld [vmem:[%s5359_s8] ss:$0 sm:$0xff] }
 0xdfc   : > { %3914 = vrot.lane.b32.xlu0 %v3913_v48, %s4360_s6  ;;  %v3682_v55 = vpop.f32.mrb[43].mxu1 }
 0xe6e   : > { %v3915_v63 = vpop.permute.xlu0 %3914 }
 0xe6f   : > { %v3917_v3 = vunpack.i.h.bf16 %v3915_v63  ;;  %v3916_v4 = vunpack.i.l.bf16 %v3915_v63  ;;  %v3982_v63 = vld [vmem:[%s4784_s16 + $0x40] sm:$0xff]  }
 0xe70   : > { %3508 = vmatprep.subr.bf16.mxu0 %v3982_v63 }
 0xe71   : > { %v2322_v7 = vsel %vm2320_vm8, %v2319_v6, %v3917_v3  ;;  %v2321_v8 = vsel %vm2320_vm8, %v2318_v5, %v3916_v4  ;;  %v3985_v3 = vld [vmem:[%s4784_s16 + $0x8] sm:$0xff]   ;;  %v3986_v4 = vld [vmem:[%s4784_s16 + $0x50] sm:$0xff]   ;;  %v3988_v6 = vld [vmem:[%s4784_s16 + $0x58] sm:$0xff]  }
 0xe72   : > { %v2323_v9 = vpack.c.bf16 %v2322_v7, %v2321_v8  ;;  %v3987_v5 = vld [vmem:[%s4784_s16 + $0x10] sm:$0xff]   ;;  %v3989_v7 = vld [vmem:[%s4784_s16 + $0x18] sm:$0xff]   ;;  %v3990_v8 = vld [vmem:[%s4784_s16 + $0x60] sm:$0xff]  }
 0xe74   : > { %3700 = vmatmul.mubr.bf16.vlgmr.msra.gmra.mrb[28].mxu0 %v2323_v9  ;;  %v3991_v9 = vld [vmem:[%s4784_s16 + $0x20] sm:$0xff]  }
 0xe75   : > { %3509 = vmatpush3.bf16.msra.mxu0 %v3983_v0 }
 0xe76   : > { %3510 = vmatprep.subr.bf16.mxu0 %v3984_v1 }
 0xe79   : > { %3511 = vmatpush3.bf16.msra.mxu0 %v3985_v3 }
 0xe7a   : > { %3512 = vmatprep.subr.bf16.mxu0 %v3986_v4 }
 0xe7d   : > { %3513 = vmatpush3.bf16.msra.mxu0 %v3987_v5  ;;  %v3414_v5 = vld [vmem:[%s944_s20] ss:$0 sm:$0xff] }
 0xe7e   : > { %3514 = vmatprep.subr.bf16.mxu0 %v3988_v6 }
 0xe81   : > { %3515 = vmatpush3.bf16.msra.mxu0 %v3989_v7 }
 0xe82   : > { %3516 = vmatprep.subr.bf16.mxu0 %v3990_v8 }
 0xe85   : > { %3517 = vmatpush3.bf16.msra.mxu0 %v3991_v9 }
 0xf47   : > { %v2429_v59 = vpop.f32.mrb[28].mxu0 }
 0xf48   : > { %v2430_v57 = vadd.f32 %v3387_v12, %v2429_v59  ;;  %v3701_v46 = vpop.f32.mrb[29].mxu0  ;;  %v3993_v59 = vld [vmem:[%s4784_s16 + $0x28] sm:$0xff]  }
 0xf49   : > { %v2432_v2 = vpop.f32.mrb[30].mxu0  ;;  %v3995_v46 = vld [vmem:[%s4784_s16 + $0x30] sm:$0xff]  }
 0xf4a   : > { %v2433_v13 = vadd.f32 %v3387_v12, %v2432_v2  ;;  %v3702_v14 = vpop.f32.mrb[31].mxu0  ;;  %v2436_v15 = vadd.f32 %v2430_v57, %v4873_v10  ;;  %v3992_v12 = vld [vmem:[%s4784_s16 + $0x68] sm:$0xff]   ;;  %v3994_v57 = vld [vmem:[%s4784_s16 + $0x70] sm:$0xff]   ;;  %v3996_v2 = vld [vmem:[%s4784_s16 + $0x78] sm:$0xff]  }
 0xf4b   : > { %3518 = vmatprep.subr.bf16.mxu0 %v3992_v12  ;;  %v2496_v14 = vld [vmem:[%s4816_s14] sm:$0x3] }
 0xf4c   : > { %2440 = vadd.xlane.f32.xlu1 %v2436_v15  ;;  %v2437_v19 = vadd.f32 %v2433_v13, %v4875_v11  ;;  %3519 = vmatpush3.bf16.msra.mxu0 %v3993_v59  ;;  %v3997_v13 = vld [vmem:[%s4784_s16 + $0x38] sm:$0xff]  }
 0xf4d   : > { %3520 = vmatprep.subr.bf16.mxu0 %v3994_v57 }
 0xf4e   : > { %2442 = vadd.xlane.f32.xlu0 %v2437_v19 }
 0xf50   : > { %3521 = vmatpush3.bf16.msra.mxu0 %v3995_v46 }
 0xf51   : > { %3522 = vmatprep.subr.bf16.mxu0 %v3996_v2 }
 0xf54   : > { %3523 = vmatpush3.bf16.msra.mxu0 %v3997_v13 }
 0xfd9   : > { %v2441_v33 = vpop.xlane.xlu1 %2440 }
 0xfda   : > { %v2445_v47 = vmul.f32 0.0078125, %v2441_v33 }
 0xfdb   : > { %v2443_v51 = vpop.xlane.xlu0 %2442 }
 0xfdc   : > { %v2447_v10 = vsub.f32 %v2436_v15, %v2445_v47  ;;  %v2446_v11 = vmul.f32 0.0078125, %v2443_v51  ;;  %v2501_v15 = vrot.slane %v2496_v14, %v4900_v20 }
 0xfde   : > { %v2448_v52 = vsub.f32 %v2437_v19, %v2446_v11  ;;  %v2449_v23 = vmul.f32 %v2447_v10, %v2447_v10  ;;  %v2505_v19 = vrot.slane %v2496_v14, %v1151_v18 }
 0xfe0   : > { %2451 = vadd.xlane.f32.xlu0 %v2449_v23  ;;  %v2450_v38 = vmul.f32 %v2448_v52, %v2448_v52 }
 0xfe4   : > { %2453 = vadd.xlane.f32.xlu0 %v2450_v38 }
0x106d   : > { %v2452_v39 = vpop.xlane.xlu0 %2451 }
0x106e   : > { %v2455_v34 = vmul.f32 0.0078125, %v2452_v39 }
0x1070   : > { %v2457_v40 = vadd.f32 1e-12, %v2455_v34 }
0x1071   : > { %v2454_v41 = vpop.xlane.xlu0 %2453 }
0x1072   : > { %4030 = vrsqrt.f32 %v2457_v40  ;;  %v2456_v42 = vmul.f32 0.0078125, %v2454_v41 }
0x1074   : > { %v2458_v43 = vadd.f32 1e-12, %v2456_v42 }
0x1076   : > { %4032 = vrsqrt.f32 %v2458_v43 }
0x107c   : > { %v4031_v44 = vpop.eup %4030 }
0x107d   : > { %v2461_v48 = vmul.f32 %v4031_v44, %v2447_v10 }
0x107f   : > { %v2469_v56 = vmul.f32 %v3396_v49, %v2461_v48 }
0x1080   : > { %v4033_v50 = vpop.eup %4032 }
0x1081   : > { %v2462_v55 = vmul.f32 %v4033_v50, %v2448_v52  ;;  %v5140_v61 = vadd.f32 %v3397_v58, %v2469_v56 }
0x1083   : > { %v2470_v60 = vmul.f32 %v3396_v49, %v2462_v55 }
0x1085   : > { %v5142_v62 = vadd.f32 %v3397_v58, %v2470_v60 }
0x1087   : > { %v2479_v54 = vpack.c.bf16 %v5142_v62, %v5140_v61 }
0x1089   : > { %2621 = vmatmul.mubr.bf16.vlgmr.msra.gmra.mrb[44].mxu1 %v2479_v54 }
0x115c   : > { %v2622_v21 = vpop.f32.mrb[44].mxu1 }
0x115d   : > { %v2623_v22 = vadd.f32 %v2622_v21, %v2501_v15  ;;  %v2624_v30 = vpop.f32.mrb[45].mxu1 }
0x115e   : > { %v2625_v29 = vadd.f32 %v2624_v30, %v2505_v19  ;;  %v2626_v33 = vpop.f32.mrb[46].mxu1 }
0x115f   : > { %v2631_v47 = vmul.f32 %v2623_v22, %v2623_v22  ;;  %v2627_v51 = vadd.f32 %v2626_v33, %v2501_v15  ;;  %v2628_v10 = vpop.f32.mrb[47].mxu1 }
0x1160   : > { %v2632_v11 = vmul.f32 %v2625_v29, %v2625_v29  ;;  %v2629_v52 = vadd.f32 %v2628_v10, %v2505_v19 }
0x1161   : > { %v2635_v23 = vmul.f32 %v2631_v47, %v2623_v22  ;;  %v2633_v38 = vmul.f32 %v2627_v51, %v2627_v51 }
0x1162   : > { %v2636_v24 = vmul.f32 %v2632_v11, %v2625_v29  ;;  %v2634_v25 = vmul.f32 %v2629_v52, %v2629_v52 }
0x1163   : > { %v2639_v26 = vmul.f32 0.044715, %v2635_v23  ;;  %v2637_v27 = vmul.f32 %v2633_v38, %v2627_v51 }
0x1164   : > { %v2640_v20 = vmul.f32 0.044715, %v2636_v24  ;;  %v2638_v28 = vmul.f32 %v2634_v25, %v2629_v52  ;;  %v3432_v24 = vld [vmem:[%s950_s22] ss:$0 sm:$0xff]  ;;  %s5365_s22 = sld [smem:[#allocation43_spill]] (!%p3433_p5) }
0x1165   : > { %v2643_v17 = vadd.f32 %v2639_v26, %v2623_v22  ;;  %v2641_v18 = vmul.f32 0.044715, %v2637_v27 }
0x1166   : > { %v2644_v45 = vadd.f32 %v2640_v20, %v2625_v29  ;;  %v2642_v31 = vmul.f32 0.044715, %v2638_v28 }
0x1167   : > { %v2647_v32 = vmul.f32 0.7978846, %v2643_v17  ;;  %v2645_v35 = vadd.f32 %v2641_v18, %v2627_v51  ;;  %v2893_v17 = vld [vmem:[#allocation12] sm:$0xff] (!%p3433_p5)  ;;  %v2894_v18 = vld [vmem:[#allocation12 + $0x8] sm:$0xff] (!%p3433_p5) }
0x1168   : > { %v2648_v36 = vmul.f32 0.7978846, %v2644_v45  ;;  %v2646_v37 = vadd.f32 %v2642_v31, %v2629_v52  ;;  %v2895_v45 = vld [vmem:[#allocation12 + $0x10] sm:$0xff] (!%p3433_p5)  ;;  %v3754_v31 = vpack.c.bf16 (!%p3433_p5), %v2894_v18, %v2893_v17 }
0x1169   : > { %4034 = vtanh.f32 %v2647_v32  ;;  %v2649_v53 = vmul.f32 0.7978846, %v2645_v35  ;;  %v2896_v32 = vld [vmem:[#allocation12 + $0x18] sm:$0xff] (!%p3433_p5) }
0x116a   : > { %4036 = vtanh.f32 %v2648_v36  ;;  %v2650_v39 = vmul.f32 0.7978846, %v2646_v37  ;;  %v3758_v35 = vpack.c.bf16 (!%p3433_p5), %v2896_v32, %v2895_v45  ;;  %v2897_v36 = vld [vmem:[#allocation12 + $0x20] sm:$0xff] (!%p3433_p5)  ;;  %v2898_v37 = vld [vmem:[#allocation12 + $0x28] sm:$0xff] (!%p3433_p5)  ;;  %3755 = vmatprep.subr.bf16.mxu0 (!%p3433_p5), %v3754_v31 }
0x116b   : > { %4038 = vtanh.f32 %v2649_v53  ;;  %v3762_v53 = vpack.c.bf16 (!%p3433_p5), %v2898_v37, %v2897_v36 }
0x116c   : > { %4040 = vtanh.f32 %v2650_v39  ;;  %v2899_v39 = vld [vmem:[#allocation12 + $0x30] sm:$0xff] (!%p3433_p5) }
0x1173   : > { %v4035_v34 = vpop.eup %4034 }
0x1174   : > { %v4037_v40 = vpop.eup %4036  ;;  %v2655_v41 = vadd.f32 1.0, %v4035_v34  ;;  %v2900_v34 = vld [vmem:[#allocation12 + $0x38] sm:$0xff] (!%p3433_p5) }
0x1175   : > { %v4039_v42 = vpop.eup %4038  ;;  %v2656_v43 = vadd.f32 1.0, %v4037_v40  ;;  %v3766_v40 = vpack.c.bf16 (!%p3433_p5), %v2900_v34, %v2899_v39 }
0x1176   : > { %v4041_v44 = vpop.eup %4040  ;;  %v2659_v48 = vmul.f32 0.5, %v2655_v41  ;;  %v2657_v49 = vadd.f32 1.0, %v4039_v42  ;;  %v2901_v41 = vld [vmem:[#allocation12 + $0x40] sm:$0xff] (!%p3433_p5)  ;;  %v2902_v42 = vld [vmem:[#allocation12 + $0x48] sm:$0xff] (!%p3433_p5) }
0x1177   : > { %v2658_v50 = vadd.f32 1.0, %v4041_v44  ;;  %v2660_v55 = vmul.f32 0.5, %v2656_v43  ;;  %v3770_v43 = vpack.c.bf16 (!%p3433_p5), %v2902_v42, %v2901_v41  ;;  %v2903_v44 = vld [vmem:[#allocation12 + $0x50] sm:$0xff] (!%p3433_p5) }
0x1178   : > { %v2661_v56 = vmul.f32 0.5, %v2657_v49  ;;  %v2663_v60 = vmul.f32 %v2659_v48, %v2623_v22  ;;  %v2904_v48 = vld [vmem:[#allocation12 + $0x58] sm:$0xff] (!%p3433_p5) }
0x1179   : > { %v2662_v58 = vmul.f32 0.5, %v2658_v50  ;;  %v2664_v63 = vmul.f32 %v2660_v55, %v2625_v29  ;;  %v3774_v49 = vpack.c.bf16 (!%p3433_p5), %v2904_v48, %v2903_v44  ;;  %v2905_v50 = vld [vmem:[#allocation12 + $0x60] sm:$0xff] (!%p3433_p5)  ;;  %v2906_v55 = vld [vmem:[#allocation12 + $0x68] sm:$0xff] (!%p3433_p5) }
0x117a   : > { %v2665_v54 = vmul.f32 %v2661_v56, %v2627_v51  ;;  %v3778_v56 = vpack.c.bf16 (!%p3433_p5), %v2906_v55, %v2905_v50 }
0x117b   : > { %v2666_v0 = vmul.f32 %v2662_v58, %v2629_v52  ;;  %v3431_v52 = vld [vmem:[%s947_s29] ss:$0 sm:$0xff] }
0x117c   : > { %v2667_v1 = vpack.c.bf16 %v2665_v54, %v2663_v60  ;;  %v2907_v58 = vld [vmem:[#allocation12 + $0x70] sm:$0xff] (!%p3433_p5)  ;;  %v2908_v60 = vld [vmem:[#allocation12 + $0x78] sm:$0xff] (!%p3433_p5) }
0x117d   : > { %v2668_v3 = vpack.c.bf16 %v2666_v0, %v2664_v63  ;;  %v3782_v54 = vpack.c.bf16 (!%p3433_p5), %v2908_v60, %v2907_v58  ;;  %v2996_v63 = vand.u32 (!%p3433_p5), 127, %v1145_v16  ;;  %v3434_v0 = vld [vmem:[%s5365_s22] ss:$0 sm:$0xff] (!%p3433_p5) }
0x117e   : > { %v2993_v16 = vld [vmem:[%s5366_s23] sm:$0xff] (!%p3433_p5) }
0x117f   : > { %2836 = vmatprep.mubr.bf16.mxu0 %v2668_v3  ;;  %vm2997_vm9 = vcmp.lt.s32.totalorder (!%p3433_p5), %v2996_v63, 5  ;;  %vm3042_vm13 = vcmp.ne.s32.totalorder (!%p3433_p5), %v2993_v16, 4294967196 }
0x1180   : > { %2837 = vmatmul.mubr.bf16.vlgmr.msra.gmra.mrb[32].mxu0 %v2667_v1 }
0x1181   : > { %3757 = vmatpush3.bf16.msra.mxu0 (!%p3433_p5), %v3754_v31 }
0x1182   : > { %3759 = vmatprep.subr.bf16.mxu0 (!%p3433_p5), %v3758_v35 }
0x1185   : > { %3761 = vmatpush3.bf16.msra.mxu0 (!%p3433_p5), %v3758_v35 }
0x1186   : > { %3763 = vmatprep.subr.bf16.mxu0 (!%p3433_p5), %v3762_v53 }
0x1189   : > { %3765 = vmatpush3.bf16.msra.mxu0 (!%p3433_p5), %v3762_v53 }
0x118a   : > { %3767 = vmatprep.subr.bf16.mxu0 (!%p3433_p5), %v3766_v40 }
0x118d   : > { %3769 = vmatpush3.bf16.msra.mxu0 (!%p3433_p5), %v3766_v40 }
0x118e   : > { %3771 = vmatprep.subr.bf16.mxu0 (!%p3433_p5), %v3770_v43 }
0x1191   : > { %3773 = vmatpush3.bf16.msra.mxu0 (!%p3433_p5), %v3770_v43 }
0x1192   : > { %3775 = vmatprep.subr.bf16.mxu0 (!%p3433_p5), %v3774_v49 }
0x1195   : > { %3777 = vmatpush3.bf16.msra.mxu0 (!%p3433_p5), %v3774_v49 }
0x1196   : > { %3779 = vmatprep.subr.bf16.mxu0 (!%p3433_p5), %v3778_v56 }
0x1199   : > { %3781 = vmatpush3.bf16.msra.mxu0 (!%p3433_p5), %v3778_v56 }
0x119a   : > { %3783 = vmatprep.subr.bf16.mxu0 (!%p3433_p5), %v3782_v54 }
0x119d   : > { %3785 = vmatpush3.bf16.msra.mxu0 (!%p3433_p5), %v3782_v54 }
0x1253   : > { %v3524_v4 = vpop.f32.mrb[32].mxu0 }
0x1254   : > { %v3525_v6 = vpop.f32.mrb[33].mxu0 }
0x1255   : > { %v3526_v7 = vadd.f32 %v3525_v6, %v3524_v4  ;;  %v3527_v8 = vpop.f32.mrb[34].mxu0 }
0x1256   : > { %v3528_v9 = vpop.f32.mrb[35].mxu0 }
0x1257   : > { %v2839_v12 = vadd.f32 %v3526_v7, %v3414_v5  ;;  %v3529_v59 = vadd.f32 %v3528_v9, %v3527_v8  ;;  %v4363_v8 = vmov (!%p3433_p5), 0  }
0x1258   : > { %4047 = vset.pattern.permute.xlu1 (!%p3433_p5), %v4363_v8  ;;  %4046 = vset.pattern.permute.xlu0 (!%p3433_p5), %v4363_v8 }
0x1259   : > { %v2842_v57 = vadd.f32 %v3529_v59, %v3414_v5  ;;  %v2845_v46 = vadd.f32 %v2839_v12, %v5140_v61 }
0x125b   : > { %2849 = vadd.xlane.f32.xlu1 %v2845_v46  ;;  %v2846_v2 = vadd.f32 %v2842_v57, %v5142_v62 }
0x125d   : > { %2851 = vadd.xlane.f32.xlu0 %v2846_v2 }
0x12e8   : > { %v2850_v13 = vpop.xlane.xlu1 %2849 }
0x12e9   : > { %v2853_v14 = vmul.f32 0.0078125, %v2850_v13 }
0x12ea   : > { %v2852_v15 = vpop.xlane.xlu0 %2851 }
0x12eb   : > { %v2855_v19 = vsub.f32 %v2845_v46, %v2853_v14  ;;  %v2854_v21 = vmul.f32 0.0078125, %v2852_v15  ;;  %v2994_v15 = vld [vmem:[%s5366_s23 + $0x8] sm:$0xff] (!%p3433_p5) }
0x12ec   : > { %vm3043_vm12 = vcmp.ne.s32.totalorder (!%p3433_p5), %v2994_v15, 4294967196 }
0x12ed   : > { %v2856_v22 = vsub.f32 %v2846_v2, %v2854_v21  ;;  %v2857_v30 = vmul.f32 %v2855_v19, %v2855_v19 }
0x12ef   : > { %2859 = vadd.xlane.f32.xlu1 %v2857_v30  ;;  %v2858_v29 = vmul.f32 %v2856_v22, %v2856_v22 }
0x12f1   : > { %2861 = vadd.xlane.f32.xlu0 %v2858_v29 }
0x137c   : > { %v2860_v33 = vpop.xlane.xlu1 %2859 }
0x137d   : > { %v2863_v47 = vmul.f32 0.0078125, %v2860_v33 }
0x137e   : > { %v2862_v51 = vpop.xlane.xlu0 %2861 }
0x137f   : > { %v2865_v61 = vadd.f32 1e-12, %v2863_v47  ;;  %v2864_v10 = vmul.f32 0.0078125, %v2862_v51 }
0x1381   : > { %4042 = vrsqrt.f32 %v2865_v61  ;;  %v2866_v62 = vadd.f32 1e-12, %v2864_v10  ;;  %v4364_v61 = vmov (!%p3433_p5), 0.0  }
0x1383   : > { %4044 = vrsqrt.f32 %v2866_v62 }
0x138b   : > { %v4043_v11 = vpop.eup %4042 }
0x138c   : > { %v2869_v23 = vmul.f32 %v4043_v11, %v2855_v19 }
0x138d   : > { %v4045_v38 = vpop.eup %4044 }
0x138e   : > { %v2877_v25 = vmul.f32 %v3431_v52, %v2869_v23  ;;  %v2870_v26 = vmul.f32 %v4045_v38, %v2856_v22  ;;  %2892 = sbr.rel (%p3433_p5) target bundleno = 5718 (0x1656), region = 136 }
0x1390   : > { %v2885_v27 = vadd.f32 %v3432_v24, %v2877_v25  ;;  %v2878_v20 = vmul.f32 %v3431_v52, %v2870_v26  ;;  %v3438_v26 = vsel (!%p3433_p5), %vm3043_vm12, 1.0, %v4364_v61 }
0x1392   : > { %2887 = vst [vmem:[#allocation2] sm:$0xff] %v2885_v27  ;;  %v2886_v28 = vadd.f32 %v3432_v24, %v2878_v20  ;;  %3735 = vmatprep.mubr.f32.mxu0 (!%p3433_p5), %v2885_v27  ;;  %v3437_v27 = vsel (!%p3433_p5), %vm3042_vm13, 1.0, %v4364_v61  ;;  %v3061_v20 = vsel (!%p3433_p5), %vm3050_vm14, %v3438_v26, 0.0 }
0x1394   : > { %2888 = vst [vmem:[#allocation2 + $0x8] sm:$0xff] %v2886_v28  ;;  %3736 = vmatmul.mubr.f32.vlgmr.msra.gmra.mrb[0].mxu0 (!%p3433_p5), %v2886_v28  ;;  %v3060_v28 = vsel (!%p3433_p5), %vm3050_vm14, %v3437_v27, 0.0 }
0x1395   : > { %v3062_v17 = vadd.f32 %v3061_v20, %v3060_v28 }
0x1397   : > { %v3063_v18 = vrot.slane %v3062_v17, 4 }
0x1399   : > { %v3064_v45 = vadd.f32 %v3063_v18, %v3062_v17 }
0x139b   : > { %v3065_v31 = vrot.slane %v3064_v45, 2 }
0x139d   : > { %v3066_v32 = vadd.f32 %v3065_v31, %v3064_v45 }
0x139f   : > { %v3067_v37 = vrot.slane %v3066_v32, 1 }
0x13a1   : > { %v3068_v40 = vadd.f32 %v3067_v37, %v3066_v32 }
0x1467   : > { %v3737_v1 = vpop.f32.mrb[0].mxu0 }
0x1468   : > { %v2988_v3 = vadd.f32 %v3737_v1, %v3434_v0  ;;  %v2982_v4 = vpop.f32.mrb[1].mxu0 }
0x1469   : > { %v2983_v5 = vadd.f32 %v3434_v0, %v2982_v4 }
0x146a   : > { %2992 = vst [vmem:[#allocation14 + $0x8] sm:$0xff] %v2988_v3  ;;  %v2999_v7 = vsel %vm2997_vm9, %v2988_v3, -1e+30 }
0x146b   : > { %2991 = vst [vmem:[#allocation14] sm:$0xff] %v2983_v5  ;;  %v2998_v6 = vsel %vm2997_vm9, %v2983_v5, -1e+30 }
0x146c   : > { %3000 = vmax.xlane.f32.xlu0 %v2998_v6 }
0x1470   : > { %3002 = vmax.xlane.f32.xlu0 %v2999_v7 }
0x1486   : > { %3023 = vperm.xlu0 %4046, %v2993_v16  }
0x14f9   : > { %v3001_v9 = vpop.xlane.xlu0 %3000 }
0x14fa   : > { %v3004_v59 = vsub.f32 %v2998_v6, %v3001_v9 }
0x14fc   : > { %v3006_v2 = vmul.f32 1.442695, %v3004_v59 }
0x14fd   : > { %v3003_v12 = vpop.xlane.xlu0 %3002 }
0x14fe   : > { %v3005_v57 = vsub.f32 %v2999_v7, %v3003_v12 }
0x1500   : > { %v3008_v46 = vmul.f32 1.442695, %v3005_v57 }
0x1502   : > { %4048 = vpow2.f32 %v3008_v46 }
0x1503   : > { %4050 = vpow2.f32 %v3006_v2 }
0x1505   : > { %v3024_v33 = vpop.permute.xlu0 %3023 }
0x1506   : > { %vm3028_vm11 = vcmp.eq.s32.totalorder %v2996_v63, %v3024_v33 }
0x1507   : > { %v3435_v38 = vsel %vm3028_vm11, 1.0, %v4364_v61 }
0x150c   : > { %v4049_v13 = vpop.eup %4048 }
0x150d   : > { %3012 = vadd.xlane.f32.xlu1 %v4049_v13  ;;  %v4051_v14 = vpop.eup %4050 }
0x1511   : > { %3010 = vadd.xlane.f32.xlu1 %v4051_v14 }
0x1522   : > { %3026 = vperm.xlu1 %4047, %v2994_v15  }
0x159a   : > { %v3013_v19 = vpop.xlane.xlu1 %3012 }
0x159b   : > { %4052 = vlog2.f32 %v3013_v19 }
0x159e   : > { %v3011_v21 = vpop.xlane.xlu1 %3010 }
0x159f   : > { %4054 = vlog2.f32 %v3011_v21 }
0x15a0   : > { %4056 = vrcp.f32 %v3068_v40 }
0x15a2   : > { %v3027_v22 = vpop.permute.xlu1 %3026 }
0x15a3   : > { %vm3029_vm10 = vcmp.eq.s32.totalorder %v2996_v63, %v3027_v22 }
0x15a4   : > { %v3436_v10 = vsel %vm3029_vm10, 1.0, %v4364_v61 }
0x15a5   : > { %v4053_v30 = vpop.eup %4052 }
0x15a6   : > { %v3017_v29 = vmul.f32 0.6931472, %v4053_v30 }
0x15a8   : > { %v3019_v47 = vadd.f32 %v3017_v29, %v3003_v12 }
0x15a9   : > { %v4055_v51 = vpop.eup %4054 }
0x15aa   : > { %v3015_v62 = vmul.f32 0.6931472, %v4055_v51  ;;  %v3021_v11 = vsub.f32 %v2999_v7, %v3019_v47  ;;  %v4057_v58 = vpop.eup %4056 }
0x15ac   : > { %v3018_v52 = vadd.f32 %v3015_v62, %v3001_v9  ;;  %v3035_v23 = vmul.f32 %v3436_v10, %v3021_v11 }
0x15ae   : > { %3038 = vadd.xlane.f32.xlu0 %v3035_v23  ;;  %v3020_v24 = vsub.f32 %v2998_v6, %v3018_v52 }
0x15b0   : > { %v3034_v25 = vmul.f32 %v3435_v38, %v3020_v24 }
0x15b2   : > { %3036 = vadd.xlane.f32.xlu1 %v3034_v25 }
0x163b   : > { %v3039_v35 = vpop.xlane.xlu0 %3038 }
0x163c   : > { %v3041_v36 = vsub.f32 0.0, %v3039_v35 }
0x163e   : > { %v3049_v39 = vmul.f32 %v3438_v26, %v3041_v36 }
0x163f   : > { %v3037_v53 = vpop.xlane.xlu1 %3036 }
0x1640   : > { %v3040_v34 = vsub.f32 0.0, %v3037_v53  ;;  %v3052_v42 = vsel %vm3050_vm14, %v3049_v39, 0.0 }
0x1642   : > { %v3048_v41 = vmul.f32 %v3437_v27, %v3040_v34 }
0x1644   : > { %v3051_v43 = vsel %vm3050_vm14, %v3048_v41, 0.0 }
0x1645   : > { %v3053_v44 = vadd.f32 %v3052_v42, %v3051_v43 }
0x1647   : > { %v3054_v48 = vrot.slane %v3053_v44, 4 }
0x1649   : > { %v3055_v49 = vadd.f32 %v3054_v48, %v3053_v44 }
0x164b   : > { %v3056_v50 = vrot.slane %v3055_v49, 2 }
0x164d   : > { %v3057_v55 = vadd.f32 %v3056_v50, %v3055_v49 }
0x164f   : > { %v3058_v56 = vrot.slane %v3057_v55, 1 }
0x1651   : > { %v3059_v60 = vadd.f32 %v3058_v56, %v3057_v55 }
0x1653   : > { %v3070_v54 = vmul.f32 %v4057_v58, %v3059_v60 }
0x1655   : > { %3072 = vst.msk [vmem:[#allocation15] sm:$0x1] %vm3071_vm15, %v3070_v54 }
0x1656 PF: > { %p3839_p2 = scmp.eq.s32.totalorder %s4620_s4, 1  ;;  %s4365_s30 = smov [#allocation14]  }
0x1657   : > { %s3079_s13 = sshll.u32 %s4365_s30, 4  ;;  %s3080_s13 = int_to_ptr.vmem [resolvable:$true] %s3079_s13 }
0x1658   : > { %s4234_s18 = scalar_lea.vmem %s3080_s13, 256  ;;  %p4241_p1 = scmp.lt.s32.totalorder %s3080_s13, %s3080_s13 }
0x1659   : > { %p4235_p8 = scmp.ne.s32.totalorder %s3080_s13, %s4234_s18  ;;  %p4242_p6 = scmp.lt.s32.totalorder %s4234_s18, %s4234_s18 }
0x165b   : > { %p4236_p9 = pnand %p4235_p8, %p3839_p2  ;;  %p4243_p10 = por %p4242_p6, %p4241_p1 }
0x165d   : > { %p4237_p12 = pneg %p4236_p9 }
0x165f   : > { %p4244_p13 = pnand %p4243_p10, %p4237_p12 }
0x1661   : > { %4247 = shalt.err (!%p4244_p13)
}
0x1662   : > { %s5367_s0 = sld [smem:[#allocation44_spill]] }
0x1668   : > { %s4248_s12 = scalar_lea.hbm %s5367_s0, 256 }
0x1669   : > { %p4249_p3 = scmp.ne.s32.totalorder %s5367_s0, %s4248_s12  ;;  %p4254_p11 = scmp.lt.u32.totalorder %s4248_s12, %s5367_s0 }
0x166b   : > { %p4250_p7 = pnand %p4249_p3, %p3839_p2 }
0x166d   : > { %p4251_p4 = pneg %p4250_p7 }
0x166f   : > { %p4256_p0 = pnand %p4254_p11, %p4251_p4 }
0x1671   : > { %4259 = shalt.err (!%p4256_p0)
}
0x1672   : > { %s4366_s20 = smov 128   ;;  %s4367_s3 = smov 8  }
0x1673   : > { %3807 = dma.vmem_to_hbm [thread:$0]  (%p3839_p2), %s3080_s13, 256, %s5367_s0, [#allocation5], %s4366_s20, %s4366_s20, %s4367_s3  }
0x1674   : > { %s4368_s26 = smov [#allocation15]  }
0x1675   : > { %s3093_s6 = sshll.u32 %s4368_s26, 4  ;;  %s3094_s6 = int_to_ptr.vmem [resolvable:$true] %s3093_s6 }
0x1676   : > { %s4260_s11 = scalar_lea.vmem %s3094_s6, 16  ;;  %s4266_s29 = scalar_lea.vmem %s3094_s6, 32 }
0x1677   : > { %p4261_p5 = scmp.ne.s32.totalorder %s3094_s6, %s4260_s11  ;;  %p4267_p12 = scmp.lt.s32.totalorder %s3094_s6, %s3094_s6 }
0x1678   : > { %p4268_p1 = scmp.lt.s32.totalorder %s4266_s29, %s4260_s11 }
0x1679   : > { %p4262_p8 = pnand %p4261_p5, %p3839_p2 }
0x167a   : > { %p4269_p6 = por %p4268_p1, %p4267_p12 }
0x167b   : > { %p4263_p9 = pneg %p4262_p8 }
0x167d   : > { %p4270_p10 = pnand %p4269_p6, %p4263_p9 }
0x167f   : > { %4273 = shalt.err (!%p4270_p10)
}
0x1680   : > { %s5368_s25 = sld [smem:[#allocation45_spill]] }
0x1686   : > { %s4274_s9 = scalar_lea.hbm %s5368_s25, 16 }
0x1687   : > { %p4275_p13 = scmp.ne.s32.totalorder %s5368_s25, %s4274_s9  ;;  %p4280_p4 = scmp.lt.u32.totalorder %s4274_s9, %s5368_s25 }
0x1689   : > { %p4276_p3 = pnand %p4275_p13, %p3839_p2 }
0x168b   : > { %p4277_p7 = pneg %p4276_p3 }
0x168d   : > { %p4282_p11 = pnand %p4280_p4, %p4277_p7 }
0x168f   : > { %4285 = shalt.err (!%p4282_p11)
}
0x1690   : > { %3809 = dma.vmem_to_hbm [thread:$0]  (%p3839_p2), %s3094_s6, 16, %s5368_s25, [#allocation16]  }
0x1691   : > { %4319 = dma.done.wait (%p3839_p2), [#allocation5], 256  }
0x1692   : > { %4321 = vsyncadd (%p3839_p2), [#allocation5], 4294967040 }
0x1693   : > { %4323 = dma.done.wait (%p3839_p2), [#allocation16], 16  }
0x1694   : > { %4325 = vsyncadd (%p3839_p2), [#allocation16], 4294967280 }
0x1695 PF: > { %s5369_s30 = sld [smem:[#allocation24_spill]]  ;;  %s5370_s12 = sld [smem:[#allocation23_spill]] }
0x1696   : > { %s5371_s29 = sld [smem:[#allocation25_spill]]  ;;  %s5372_s3 = smov %s4332_s28 }
0x169b   : > { %p40_p0 = scmp.ge.s32.totalorder %s5369_s30, 4   ;;  %s5373_s28 = smov %s5370_s12 }
0x169d   :  { %42 = sbr.rel (!%p40_p0) target bundleno = 30 (0x1e), region = 225 }
0x16a4   :  { %3110 = vsyncpa [#allocation4], 1 }
0x16a5   :  { %3112 = vsyncpa [#allocation4 + $0x1], 1 }
0x16a6   :  { %3113 = vsyncpa [#allocation7], 1 }
0x16a7   :  { %3115 = vsyncpa [#allocation7 + $0x1], 1 }
0x16a8   :  { %3116 = vsyncpa [#allocation10], 1 }
0x16a9   :  { %3118 = vsyncpa [#allocation10 + $0x1], 1 }
0x16aa   :  { %3119 = vsyncpa [#allocation13], 1 }
0x16ab   :  { %3120 = vsyncpa [#allocation5], 1 }
0x16ac   :  { %3122 = vsyncpa [#allocation5 + $0x1], 1 }
0x16ad   :  { %3123 = vsyncpa [#allocation16], 1 }

</bundles_post_ra>
